<compile_context>
chip_gen: v6e
topology: v6e:2x2x1
jax: 0.10.0
libtpu: 0.0.40
codegen_flags: <defaults>
</compile_context>

<pallas_src>
import functools

import jax
import jax.numpy as jnp
from jax.experimental import pallas as pl
from jax.experimental.pallas import tpu as pltpu


def _round_up(x, m):
    return ((x + m - 1) // m) * m


def _vmem_budget_bytes():
    """~60% of per-core VMEM (hardware-derived), conservative fallback = v7x 64 MiB."""
    try:
        cap = pltpu.get_tpu_info().vmem_capacity_bytes
    except Exception:  # pragma: no cover - e.g. attribute name drift / no TPU info
        cap = 64 * 1024 * 1024
    return max(int(0.6 * cap), 16 * 1024 * 1024)


def _make_cbr_kernel(*, th, Wo, Cin, KH, KW, stride, Coutp):
    """Kernel for one (batch, output-row-tile) grid point.

    x_ref:     (1, Hp, Wp, Cin)     f32  — whole padded image (resident across row tiles)
    w_ref:     (KH*KW, Cin, Coutp)  bf16 — folded conv*BN weights (resident)
    shift_ref: (1, Coutp)           f32  — folded conv-bias + BN shift (resident)
    o_ref:     (1, th, Wo, Coutp)         — output row tile
    """

    def kernel(x_ref, w_ref, shift_ref, o_ref):
        i = pl.program_id(1)
        r0 = pl.multiple_of(i * (th * stride), th * stride)

        acc = jnp.zeros((th * Wo, Coutp), jnp.float32)
        for kh in range(KH):
            for kw in range(KW):
                if stride == 1:
                    rows = pl.ds(r0 + kh, th)
                    cols = pl.ds(kw, Wo)
                else:
                    rows = pl.ds(r0 + kh, th, stride)
                    cols = pl.ds(kw, Wo, stride)
                xs = x_ref[0, rows, cols, :]                       # (th, Wo, Cin)
                xs = xs.reshape(th * Wo, Cin).astype(jnp.bfloat16)
                acc = acc + jnp.dot(xs, w_ref[kh * KW + kw],
                                    preferred_element_type=jnp.float32)

        acc = acc + shift_ref[...]          # folded conv bias + eval-mode BN affine
        acc = jnp.maximum(acc, 0.0)         # ReLU
        o_ref[...] = acc.reshape(1, th, Wo, Coutp).astype(o_ref.dtype)

    return kernel


def _pick_row_tile(*, N, Ho, Wo, Hp, Wp, Cin, Coutp, KH, KW, budget):
    """Largest divisor of Ho whose VMEM working set fits `budget`; split further
    (when possible) so a two-TensorCore chip never sees a single-shard grid."""

    def vmem_need(th):
        x_blk = 2 * Hp * Wp * Cin * 4            # f32 image block, double-buffered
        w_blk = 2 * KH * KW * Cin * Coutp * 2    # bf16 weights, double-buffered
        s_blk = 2 * Coutp * 4                    # shift
        o_blk = 2 * th * Wo * Coutp * 4          # output tile, double-buffered
        acc = th * Wo * Coutp * 4                # live accumulator
        taps = 2 * th * Wo * Cin * 4             # live slice + bf16 cast
        return int(1.2 * (x_blk + w_blk + s_blk + o_blk + acc + taps))

    divs = sorted((d for d in range(1, Ho + 1) if Ho % d == 0), reverse=True)
    th = 1
    for d in divs:
        if vmem_need(d) <= budget:
            th = d
            break
    if N * (Ho // th) < 2:                       # keep both v7x TensorCores busy
        for d in divs:
            if Ho // d >= 2 and vmem_need(d) <= budget:
                th = d
                break
    return th


def conv2d_batchnorm_relu(x_nchw, params, *, stride, padding, eps=1e-5,
                          out_dtype=jnp.float32):
    """Forward pass matching nn.Conv2d -> nn.BatchNorm2d(eval) -> nn.ReLU.

    x_nchw: (N, Cin, H, W) float32
    params: conv weight (Cout, Cin, KH, KW), conv bias (Cout,) [optional],
            bn gamma/beta/running_mean/running_var (Cout,)
    """
    w = params["conv_weight"]
    b = params.get("conv_bias")
    gamma = params["bn_gamma"]
    beta = params["bn_beta"]
    rmean = params["bn_running_mean"]
    rvar = params["bn_running_var"]

    N, Cin, H, W = x_nchw.shape
    Cout, _, KH, KW = w.shape
    if b is None:
        b = jnp.zeros((Cout,), jnp.float32)

    Ho = (H + 2 * padding - KH) // stride + 1
    Wo = (W + 2 * padding - KW) // stride + 1
    Hp, Wp = H + 2 * padding, W + 2 * padding

    # --- host-side glue (small): NCHW -> NHWC + spatial zero pad of the INPUT only.
    x = jnp.transpose(x_nchw, (0, 2, 3, 1)).astype(jnp.float32)
    xp = jnp.pad(x, ((0, 0), (padding, padding), (padding, padding), (0, 0)))

    # --- fold eval-mode BN + conv bias into the weights / a single shift:
    #       y = (x (*) W + b) * scale + shift0  ==  x (*) (W*scale) + (b*scale + shift0)
    scale = gamma / jnp.sqrt(rvar + eps)                           # (Cout,)
    shift = beta - rmean * scale + b * scale                       # (Cout,)
    w_f = w * scale[:, None, None, None]                           # f32 fold, then cast
    w_mat = jnp.transpose(w_f, (2, 3, 1, 0)).reshape(KH * KW, Cin, Cout)

    # Pad Cout to a lane-dense multiple of 128 (zero columns, sliced off below).
    Coutp = _round_up(Cout, 128)
    if Coutp != Cout:
        w_mat = jnp.pad(w_mat, ((0, 0), (0, 0), (0, Coutp - Cout)))
        shift = jnp.pad(shift, ((0, Coutp - Cout),))
    w_mat = w_mat.astype(jnp.bfloat16)
    shift = shift.reshape(1, Coutp).astype(jnp.float32)

    budget = _vmem_budget_bytes()
    th = _pick_row_tile(N=N, Ho=Ho, Wo=Wo, Hp=Hp, Wp=Wp, Cin=Cin, Coutp=Coutp,
                        KH=KH, KW=KW, budget=budget)
    n_tiles = Ho // th

    kernel = _make_cbr_kernel(th=th, Wo=Wo, Cin=Cin, KH=KH, KW=KW,
                              stride=stride, Coutp=Coutp)

    out = pl.pallas_call(
        kernel,
        out_shape=jax.ShapeDtypeStruct((N, Ho, Wo, Coutp), out_dtype),
        grid=(N, n_tiles),
        in_specs=[
            # whole padded image per batch element; constant across row tiles -> one DMA
            pl.BlockSpec((1, Hp, Wp, Cin), lambda n, i: (n, 0, 0, 0)),
            # folded weights / shift: constant index -> resident, fetched once
            pl.BlockSpec((KH * KW, Cin, Coutp), lambda n, i: (0, 0, 0)),
            pl.BlockSpec((1, Coutp), lambda n, i: (0, 0)),
        ],
        out_specs=pl.BlockSpec((1, th, Wo, Coutp), lambda n, i: (n, i, 0, 0)),
        compiler_params=pltpu.CompilerParams(
            dimension_semantics=("parallel", "parallel"),
            vmem_limit_bytes=budget,
        ),
    )(xp, w_mat, shift)                                            # (N, Ho, Wo, Coutp)

    out = out[..., :Cout]                                          # drop lane padding
    # NOTE: returning NHWC would avoid this extra full-output transpose pass; NCHW is
    # kept to match the PyTorch module's output layout.
    return jnp.transpose(out, (0, 3, 1, 2))


def _reference(x_nchw, params, *, stride, padding, eps=1e-5):
    """Pure-JAX reference (lax.conv) for correctness checking."""
    w = params["conv_weight"]
    y = jax.lax.conv_general_dilated(
        x_nchw, w, window_strides=(stride, stride),
        padding=[(padding, padding), (padding, padding)],
        dimension_numbers=("NCHW", "OIHW", "NCHW"),
    )
    y = y + params["conv_bias"][None, :, None, None]
    scale = params["bn_gamma"] / jnp.sqrt(params["bn_running_var"] + eps)
    shift = params["bn_beta"] - params["bn_running_mean"] * scale
    y = y * scale[None, :, None, None] + shift[None, :, None, None]
    return jnp.maximum(y, 0.0)


if __name__ == "__main__":
    # Module hyperparameters (small, consistent with Conv2DBatchNormRelu __init__).
    in_channels, n_filters, k_size, stride, padding = 4, 8, 3, 1, 1
    N, H, W = 2, 16, 16

    key = jax.random.PRNGKey(0)
    k_x, k_w, k_b, k_g, k_be, k_rm, k_rv = jax.random.split(key, 7)

    x = jax.random.normal(k_x, (N, in_channels, H, W), dtype=jnp.float32)

    params = {
        "conv_weight": 0.1 * jax.random.normal(
            k_w, (n_filters, in_channels, k_size, k_size), dtype=jnp.float32),
        "conv_bias": 0.1 * jax.random.normal(k_b, (n_filters,), dtype=jnp.float32),
        "bn_gamma": 1.0 + 0.1 * jax.random.normal(k_g, (n_filters,), dtype=jnp.float32),
        "bn_beta": 0.1 * jax.random.normal(k_be, (n_filters,), dtype=jnp.float32),
        "bn_running_mean": 0.1 * jax.random.normal(k_rm, (n_filters,), dtype=jnp.float32),
        "bn_running_var": jnp.abs(
            1.0 + 0.1 * jax.random.normal(k_rv, (n_filters,), dtype=jnp.float32)),
    }

    fwd = jax.jit(functools.partial(conv2d_batchnorm_relu, stride=stride, padding=padding))
    out = jax.block_until_ready(fwd(x, params))

    ref = _reference(x, params, stride=stride, padding=padding)
    assert out.shape == (N, n_filters, H, W), out.shape
    # bf16 folded weights (f32 activations, f32 accumulation) -> loosened tolerance.
    max_err = float(jnp.max(jnp.abs(out - ref)))
    assert jnp.allclose(out, ref, atol=2e-2, rtol=2e-2), max_err

    print("KERNEL_OK")
</pallas_src>

<mosaic_0001>
module attributes {stable_mosaic.version = 11 : i64} {
  func.func @kernel(%arg0: i32, %arg1: i32, %arg2: memref<1x18x18x4xf32, #tpu.memory_space<vmem>>, %arg3: memref<9x4x128xbf16, #tpu.memory_space<vmem>>, %arg4: memref<1x128xf32, #tpu.memory_space<vmem>>, %arg5: memref<1x16x16x128xf32, #tpu.memory_space<vmem>>) attributes {dimension_semantics = [#tpu.dimension_semantics<parallel>, #tpu.dimension_semantics<parallel>], iteration_bounds = array<i64: 2, 1>, scalar_prefetch = 0 : i64, scratch_operands = 0 : i64, tpu.core_type = #tpu.core_type<tc>, window_params = [{transform_indices = @transform_0, window_bounds = array<i64: 1, 18, 18, 4>}, {pipeline_mode = #tpu.pipeline_mode<synchronous>, transform_indices = @transform_1, window_bounds = array<i64: 9, 4, 128>}, {pipeline_mode = #tpu.pipeline_mode<synchronous>, transform_indices = @transform_2, window_bounds = array<i64: 1, 128>}, {transform_indices = @transform_3, window_bounds = array<i64: 1, 16, 16, 128>}]} {
    %c16_i32 = arith.constant 16 : i32
    %0 = arith.muli %arg1, %c16_i32 : i32
    %1 = tpu.assume_multiple %0, 16 : i32
    %cst = arith.constant 0.000000e+00 : f32
    %2 = vector.broadcast %cst : f32 to vector<256x128xf32>
    %c0_i32 = arith.constant 0 : i32
    %3 = arith.addi %1, %c0_i32 : i32
    %c0 = arith.constant 0 : index
    %4 = arith.index_cast %3 : i32 to index
    %c0_0 = arith.constant 0 : index
    %c0_1 = arith.constant 0 : index
    %5 = vector.load %arg2[%c0, %4, %c0_0, %c0_1] : memref<1x18x18x4xf32, #tpu.memory_space<vmem>>, vector<1x16x16x4xf32>
    %6 = vector.shape_cast %5 : vector<1x16x16x4xf32> to vector<16x16x4xf32>
    %7 = vector.shape_cast %6 : vector<16x16x4xf32> to vector<256x4xf32>
    %8 = arith.truncf %7 : vector<256x4xf32> to vector<256x4xbf16>
    %c0_2 = arith.constant 0 : index
    %c0_3 = arith.constant 0 : index
    %c0_4 = arith.constant 0 : index
    %9 = vector.load %arg3[%c0_2, %c0_3, %c0_4] : memref<9x4x128xbf16, #tpu.memory_space<vmem>>, vector<1x4x128xbf16>
    %10 = vector.shape_cast %9 : vector<1x4x128xbf16> to vector<4x128xbf16>
    %cst_5 = arith.constant dense<0.000000e+00> : vector<256x128xf32>
    %11 = tpu.matmul %8, %10, %cst_5 {dimension_numbers = #tpu.dot_dimension_numbers<[1], [0], [0], [1], [0, 0, 1, 1], [], []>} : vector<256x4xbf16>, vector<4x128xbf16>, vector<256x128xf32> -> vector<256x128xf32>
    %12 = arith.addf %2, %11 : vector<256x128xf32>
    %c0_i32_6 = arith.constant 0 : i32
    %13 = arith.addi %1, %c0_i32_6 : i32
    %c0_7 = arith.constant 0 : index
    %14 = arith.index_cast %13 : i32 to index
    %c1 = arith.constant 1 : index
    %c0_8 = arith.constant 0 : index
    %15 = vector.load %arg2[%c0_7, %14, %c1, %c0_8] : memref<1x18x18x4xf32, #tpu.memory_space<vmem>>, vector<1x16x16x4xf32>
    %16 = vector.shape_cast %15 : vector<1x16x16x4xf32> to vector<16x16x4xf32>
    %17 = vector.shape_cast %16 : vector<16x16x4xf32> to vector<256x4xf32>
    %18 = arith.truncf %17 : vector<256x4xf32> to vector<256x4xbf16>
    %c1_9 = arith.constant 1 : index
    %c0_10 = arith.constant 0 : index
    %c0_11 = arith.constant 0 : index
    %19 = vector.load %arg3[%c1_9, %c0_10, %c0_11] : memref<9x4x128xbf16, #tpu.memory_space<vmem>>, vector<1x4x128xbf16>
    %20 = vector.shape_cast %19 : vector<1x4x128xbf16> to vector<4x128xbf16>
    %cst_12 = arith.constant dense<0.000000e+00> : vector<256x128xf32>
    %21 = tpu.matmul %18, %20, %cst_12 {dimension_numbers = #tpu.dot_dimension_numbers<[1], [0], [0], [1], [0, 0, 1, 1], [], []>} : vector<256x4xbf16>, vector<4x128xbf16>, vector<256x128xf32> -> vector<256x128xf32>
    %22 = arith.addf %12, %21 : vector<256x128xf32>
    %c0_i32_13 = arith.constant 0 : i32
    %23 = arith.addi %1, %c0_i32_13 : i32
    %c0_14 = arith.constant 0 : index
    %24 = arith.index_cast %23 : i32 to index
    %c2 = arith.constant 2 : index
    %c0_15 = arith.constant 0 : index
    %25 = vector.load %arg2[%c0_14, %24, %c2, %c0_15] : memref<1x18x18x4xf32, #tpu.memory_space<vmem>>, vector<1x16x16x4xf32>
    %26 = vector.shape_cast %25 : vector<1x16x16x4xf32> to vector<16x16x4xf32>
    %27 = vector.shape_cast %26 : vector<16x16x4xf32> to vector<256x4xf32>
    %28 = arith.truncf %27 : vector<256x4xf32> to vector<256x4xbf16>
    %c2_16 = arith.constant 2 : index
    %c0_17 = arith.constant 0 : index
    %c0_18 = arith.constant 0 : index
    %29 = vector.load %arg3[%c2_16, %c0_17, %c0_18] : memref<9x4x128xbf16, #tpu.memory_space<vmem>>, vector<1x4x128xbf16>
    %30 = vector.shape_cast %29 : vector<1x4x128xbf16> to vector<4x128xbf16>
    %cst_19 = arith.constant dense<0.000000e+00> : vector<256x128xf32>
    %31 = tpu.matmul %28, %30, %cst_19 {dimension_numbers = #tpu.dot_dimension_numbers<[1], [0], [0], [1], [0, 0, 1, 1], [], []>} : vector<256x4xbf16>, vector<4x128xbf16>, vector<256x128xf32> -> vector<256x128xf32>
    %32 = arith.addf %22, %31 : vector<256x128xf32>
    %c1_i32 = arith.constant 1 : i32
    %33 = arith.addi %1, %c1_i32 : i32
    %c0_20 = arith.constant 0 : index
    %34 = arith.index_cast %33 : i32 to index
    %c0_21 = arith.constant 0 : index
    %c0_22 = arith.constant 0 : index
    %35 = vector.load %arg2[%c0_20, %34, %c0_21, %c0_22] : memref<1x18x18x4xf32, #tpu.memory_space<vmem>>, vector<1x16x16x4xf32>
    %36 = vector.shape_cast %35 : vector<1x16x16x4xf32> to vector<16x16x4xf32>
    %37 = vector.shape_cast %36 : vector<16x16x4xf32> to vector<256x4xf32>
    %38 = arith.truncf %37 : vector<256x4xf32> to vector<256x4xbf16>
    %c3 = arith.constant 3 : index
    %c0_23 = arith.constant 0 : index
    %c0_24 = arith.constant 0 : index
    %39 = vector.load %arg3[%c3, %c0_23, %c0_24] : memref<9x4x128xbf16, #tpu.memory_space<vmem>>, vector<1x4x128xbf16>
    %40 = vector.shape_cast %39 : vector<1x4x128xbf16> to vector<4x128xbf16>
    %cst_25 = arith.constant dense<0.000000e+00> : vector<256x128xf32>
    %41 = tpu.matmul %38, %40, %cst_25 {dimension_numbers = #tpu.dot_dimension_numbers<[1], [0], [0], [1], [0, 0, 1, 1], [], []>} : vector<256x4xbf16>, vector<4x128xbf16>, vector<256x128xf32> -> vector<256x128xf32>
    %42 = arith.addf %32, %41 : vector<256x128xf32>
    %c1_i32_26 = arith.constant 1 : i32
    %43 = arith.addi %1, %c1_i32_26 : i32
    %c0_27 = arith.constant 0 : index
    %44 = arith.index_cast %43 : i32 to index
    %c1_28 = arith.constant 1 : index
    %c0_29 = arith.constant 0 : index
    %45 = vector.load %arg2[%c0_27, %44, %c1_28, %c0_29] : memref<1x18x18x4xf32, #tpu.memory_space<vmem>>, vector<1x16x16x4xf32>
    %46 = vector.shape_cast %45 : vector<1x16x16x4xf32> to vector<16x16x4xf32>
    %47 = vector.shape_cast %46 : vector<16x16x4xf32> to vector<256x4xf32>
    %48 = arith.truncf %47 : vector<256x4xf32> to vector<256x4xbf16>
    %c4 = arith.constant 4 : index
    %c0_30 = arith.constant 0 : index
    %c0_31 = arith.constant 0 : index
    %49 = vector.load %arg3[%c4, %c0_30, %c0_31] : memref<9x4x128xbf16, #tpu.memory_space<vmem>>, vector<1x4x128xbf16>
    %50 = vector.shape_cast %49 : vector<1x4x128xbf16> to vector<4x128xbf16>
    %cst_32 = arith.constant dense<0.000000e+00> : vector<256x128xf32>
    %51 = tpu.matmul %48, %50, %cst_32 {dimension_numbers = #tpu.dot_dimension_numbers<[1], [0], [0], [1], [0, 0, 1, 1], [], []>} : vector<256x4xbf16>, vector<4x128xbf16>, vector<256x128xf32> -> vector<256x128xf32>
    %52 = arith.addf %42, %51 : vector<256x128xf32>
    %c1_i32_33 = arith.constant 1 : i32
    %53 = arith.addi %1, %c1_i32_33 : i32
    %c0_34 = arith.constant 0 : index
    %54 = arith.index_cast %53 : i32 to index
    %c2_35 = arith.constant 2 : index
    %c0_36 = arith.constant 0 : index
    %55 = vector.load %arg2[%c0_34, %54, %c2_35, %c0_36] : memref<1x18x18x4xf32, #tpu.memory_space<vmem>>, vector<1x16x16x4xf32>
    %56 = vector.shape_cast %55 : vector<1x16x16x4xf32> to vector<16x16x4xf32>
    %57 = vector.shape_cast %56 : vector<16x16x4xf32> to vector<256x4xf32>
    %58 = arith.truncf %57 : vector<256x4xf32> to vector<256x4xbf16>
    %c5 = arith.constant 5 : index
    %c0_37 = arith.constant 0 : index
    %c0_38 = arith.constant 0 : index
    %59 = vector.load %arg3[%c5, %c0_37, %c0_38] : memref<9x4x128xbf16, #tpu.memory_space<vmem>>, vector<1x4x128xbf16>
    %60 = vector.shape_cast %59 : vector<1x4x128xbf16> to vector<4x128xbf16>
    %cst_39 = arith.constant dense<0.000000e+00> : vector<256x128xf32>
    %61 = tpu.matmul %58, %60, %cst_39 {dimension_numbers = #tpu.dot_dimension_numbers<[1], [0], [0], [1], [0, 0, 1, 1], [], []>} : vector<256x4xbf16>, vector<4x128xbf16>, vector<256x128xf32> -> vector<256x128xf32>
    %62 = arith.addf %52, %61 : vector<256x128xf32>
    %c2_i32 = arith.constant 2 : i32
    %63 = arith.addi %1, %c2_i32 : i32
    %c0_40 = arith.constant 0 : index
    %64 = arith.index_cast %63 : i32 to index
    %c0_41 = arith.constant 0 : index
    %c0_42 = arith.constant 0 : index
    %65 = vector.load %arg2[%c0_40, %64, %c0_41, %c0_42] : memref<1x18x18x4xf32, #tpu.memory_space<vmem>>, vector<1x16x16x4xf32>
    %66 = vector.shape_cast %65 : vector<1x16x16x4xf32> to vector<16x16x4xf32>
    %67 = vector.shape_cast %66 : vector<16x16x4xf32> to vector<256x4xf32>
    %68 = arith.truncf %67 : vector<256x4xf32> to vector<256x4xbf16>
    %c6 = arith.constant 6 : index
    %c0_43 = arith.constant 0 : index
    %c0_44 = arith.constant 0 : index
    %69 = vector.load %arg3[%c6, %c0_43, %c0_44] : memref<9x4x128xbf16, #tpu.memory_space<vmem>>, vector<1x4x128xbf16>
    %70 = vector.shape_cast %69 : vector<1x4x128xbf16> to vector<4x128xbf16>
    %cst_45 = arith.constant dense<0.000000e+00> : vector<256x128xf32>
    %71 = tpu.matmul %68, %70, %cst_45 {dimension_numbers = #tpu.dot_dimension_numbers<[1], [0], [0], [1], [0, 0, 1, 1], [], []>} : vector<256x4xbf16>, vector<4x128xbf16>, vector<256x128xf32> -> vector<256x128xf32>
    %72 = arith.addf %62, %71 : vector<256x128xf32>
    %c2_i32_46 = arith.constant 2 : i32
    %73 = arith.addi %1, %c2_i32_46 : i32
    %c0_47 = arith.constant 0 : index
    %74 = arith.index_cast %73 : i32 to index
    %c1_48 = arith.constant 1 : index
    %c0_49 = arith.constant 0 : index
    %75 = vector.load %arg2[%c0_47, %74, %c1_48, %c0_49] : memref<1x18x18x4xf32, #tpu.memory_space<vmem>>, vector<1x16x16x4xf32>
    %76 = vector.shape_cast %75 : vector<1x16x16x4xf32> to vector<16x16x4xf32>
    %77 = vector.shape_cast %76 : vector<16x16x4xf32> to vector<256x4xf32>
    %78 = arith.truncf %77 : vector<256x4xf32> to vector<256x4xbf16>
    %c7 = arith.constant 7 : index
    %c0_50 = arith.constant 0 : index
    %c0_51 = arith.constant 0 : index
    %79 = vector.load %arg3[%c7, %c0_50, %c0_51] : memref<9x4x128xbf16, #tpu.memory_space<vmem>>, vector<1x4x128xbf16>
    %80 = vector.shape_cast %79 : vector<1x4x128xbf16> to vector<4x128xbf16>
    %cst_52 = arith.constant dense<0.000000e+00> : vector<256x128xf32>
    %81 = tpu.matmul %78, %80, %cst_52 {dimension_numbers = #tpu.dot_dimension_numbers<[1], [0], [0], [1], [0, 0, 1, 1], [], []>} : vector<256x4xbf16>, vector<4x128xbf16>, vector<256x128xf32> -> vector<256x128xf32>
    %82 = arith.addf %72, %81 : vector<256x128xf32>
    %c2_i32_53 = arith.constant 2 : i32
    %83 = arith.addi %1, %c2_i32_53 : i32
    %c0_54 = arith.constant 0 : index
    %84 = arith.index_cast %83 : i32 to index
    %c2_55 = arith.constant 2 : index
    %c0_56 = arith.constant 0 : index
    %85 = vector.load %arg2[%c0_54, %84, %c2_55, %c0_56] : memref<1x18x18x4xf32, #tpu.memory_space<vmem>>, vector<1x16x16x4xf32>
    %86 = vector.shape_cast %85 : vector<1x16x16x4xf32> to vector<16x16x4xf32>
    %87 = vector.shape_cast %86 : vector<16x16x4xf32> to vector<256x4xf32>
    %88 = arith.truncf %87 : vector<256x4xf32> to vector<256x4xbf16>
    %c8 = arith.constant 8 : index
    %c0_57 = arith.constant 0 : index
    %c0_58 = arith.constant 0 : index
    %89 = vector.load %arg3[%c8, %c0_57, %c0_58] : memref<9x4x128xbf16, #tpu.memory_space<vmem>>, vector<1x4x128xbf16>
    %90 = vector.shape_cast %89 : vector<1x4x128xbf16> to vector<4x128xbf16>
    %cst_59 = arith.constant dense<0.000000e+00> : vector<256x128xf32>
    %91 = tpu.matmul %88, %90, %cst_59 {dimension_numbers = #tpu.dot_dimension_numbers<[1], [0], [0], [1], [0, 0, 1, 1], [], []>} : vector<256x4xbf16>, vector<4x128xbf16>, vector<256x128xf32> -> vector<256x128xf32>
    %92 = arith.addf %82, %91 : vector<256x128xf32>
    %c0_60 = arith.constant 0 : index
    %c0_61 = arith.constant 0 : index
    %93 = vector.load %arg4[%c0_60, %c0_61] : memref<1x128xf32, #tpu.memory_space<vmem>>, vector<1x128xf32>
    %94 = vector.broadcast %93 : vector<1x128xf32> to vector<256x128xf32>
    %95 = arith.addf %92, %94 : vector<256x128xf32>
    %cst_62 = arith.constant 0.000000e+00 : f32
    %96 = vector.broadcast %cst_62 : f32 to vector<256x128xf32>
    %97 = arith.maximumf %95, %96 : vector<256x128xf32>
    %98 = vector.shape_cast %97 : vector<256x128xf32> to vector<1x16x16x128xf32>
    %c0_63 = arith.constant 0 : index
    %c0_64 = arith.constant 0 : index
    %c0_65 = arith.constant 0 : index
    %c0_66 = arith.constant 0 : index
    %99 = vector.load %arg5[%c0_63, %c0_64, %c0_65, %c0_66] : memref<1x16x16x128xf32, #tpu.memory_space<vmem>>, vector<1x16x16x128xf32>
    tpu.vector_store %arg5[%c0_63, %c0_64, %c0_65, %c0_66], %98 {strides = array<i32>} : memref<1x16x16x128xf32, #tpu.memory_space<vmem>>, vector<1x16x16x128xf32>,
    return
  }
  func.func @transform_0(%arg0: i32, %arg1: i32) -> (i32, i32, i32, i32) {
    %c0_i32 = arith.constant 0 : i32
    %c0_i32_0 = arith.constant 0 : i32
    %c0_i32_1 = arith.constant 0 : i32
    %c0_i32_2 = arith.constant 0 : i32
    return %arg0, %c0_i32, %c0_i32_0, %c0_i32_1 : i32, i32, i32, i32
  }
  func.func @transform_1(%arg0: i32, %arg1: i32) -> (i32, i32, i32) {
    %c0_i32 = arith.constant 0 : i32
    %c0_i32_0 = arith.constant 0 : i32
    %c0_i32_1 = arith.constant 0 : i32
    %c0_i32_2 = arith.constant 0 : i32
    return %c0_i32, %c0_i32_0, %c0_i32_1 : i32, i32, i32
  }
  func.func @transform_2(%arg0: i32, %arg1: i32) -> (i32, i32) {
    %c0_i32 = arith.constant 0 : i32
    %c0_i32_0 = arith.constant 0 : i32
    %c0_i32_1 = arith.constant 0 : i32
    return %c0_i32, %c0_i32_0 : i32, i32
  }
  func.func @transform_3(%arg0: i32, %arg1: i32) -> (i32, i32, i32, i32) {
    %c0_i32 = arith.constant 0 : i32
    %c0_i32_0 = arith.constant 0 : i32
    %c0_i32_1 = arith.constant 0 : i32
    return %arg0, %arg1, %c0_i32, %c0_i32_0 : i32, i32, i32, i32
  }
}

</mosaic_0001>

<bundles_post_ra>
// kernel: conv2d_batchnorm_relu.1
= control target key start
LH: loop header
LB: loop body
LE: loop exit
PB: predicated region body
PF: predicated region fallthrough
CT: control target
= control target key end

     0   :  { %s3885_s12 = smov 0   ;;  %s3887_s13 = smov 0   ;;  %s5012_s0 = inlined_call_operand.vmem [shape: f32[2,18,18,4], index: 0, kind: input, shape index: {}]   ;;  %s5013_s1 = inlined_call_operand.vmem [shape: bf16[9,4,128], index: 1, kind: input, shape index: {}]   ;;  %s5014_s2 = inlined_call_operand.vmem [shape: f32[1,128], index: 2, kind: input, shape index: {}]   ;;  %s5015_s3 = inlined_call_operand.vmem [shape: f32[2,16,16,128], index: 3, kind: output, shape index: {}]  }
   0x1   :  { %s3889_s14 = smov 0  }
   0x2 LB: > { %s25_s15 = sadd.s32 1, %s3859_s13  ;;  %p2993_p0 = scmp.ge.s32.totalorder %s3863_s14, 1  ;;  %s3863_s14 = sphi %s3889_s14, %s13_s14   ;;  %s3859_s13 = sphi %s3887_s13, %s5099_s13   ;;  %s3855_s12 = sphi %s3885_s12, %s5098_s12  }
   0x3   : > { %p27_p1 = scmp.ge.s32.totalorder %s25_s15, 2  ;;  %p151_p2 = scmp.lt.s32.totalorder %s3863_s14, 3 }
   0x5   : > { %s5101_s15 = smov (%p27_p1, %s25_s15), 0  ;;  %p152_p3 = pnand %p2993_p0, %p151_p2 }
   0x7   : > { %155 = sbr.rel (%p152_p3) target bundleno = 512 (0x200), region = 32 }
   0xc   : > { %v2997_v0 = vld [vmem:[%s5013_s1 + $0x2] sm:$0x3]  ;;  %vm348_vm0 = vcmask 1041408   ;;  %p180_p4 = scmp.lt.s32.totalorder %s3855_s12, 1  ;;  %v248_v2 = vld [vmem:[%s5013_s1] sm:$0x3] }
   0xd   : > { %3807 = vmatprep.subr.msk.bf16.mxu1 %vm348_vm0, %v2997_v0  ;;  %3806 = vmatprep.subr.msk.bf16.mxu0 %vm348_vm0, %v2997_v0  ;;  %v350_v1 = vsel %vm348_vm0, %v2997_v0, 0  ;;  %v3030_v3 = vld [vmem:[%s5013_s1 + $0x4] sm:$0x3]  ;;  %vm299_vm1 = vcmask 31744   ;;  %v562_v18 = vsel %vm348_vm0, %v248_v2, 0 }
   0xe   : > { %3805 = vmatpush3.bf16.msra.mxu1 %v350_v1  ;;  %3499 = vmatpush3.bf16.msra.mxu0 %v350_v1  ;;  %s5103_s12 = smov (!%p180_p4, %s3855_s12), 1  ;;  %v824_v15 = vsel %vm348_vm0, %v3030_v3, 0  ;;  %v3957_v24 = vld [vmem:[%s5013_s1 + $0x6] sm:$0x3]  ;;  %v3962_v25 = vld [vmem:[%s5013_s1 + $0x8] sm:$0x3] }
   0xf   : > { %3808 = vmatprep.subr.msk.bf16.mxu1 %vm348_vm0, %v248_v2  ;;  %3809 = vmatprep.subr.msk.bf16.mxu0 %vm348_vm0, %v3030_v3  ;;  %s3816_s22 = smul.u32 432, %s5103_s12  ;;  %s3344_s17 = sshll.u32 %s5103_s12, 8 }
  0x10   : > { %s4861_s19 = scalar_lea.vmem %s5015_s3, %s3344_s17 }
  0x11   : > { %s3923_s25 = scalar_lea.vmem %s5012_s0, %s3816_s22 }
  0x12   : > { %v249_v4 = vld [vmem:[%s3923_s25 + $0x1] sm:$0xff]  ;;  %v250_v5 = vld [vmem:[%s3923_s25 + $0x9] sm:$0xff]  ;;  %v251_v9 = vld [vmem:[%s3923_s25 + $0x19] sm:$0xff] }
  0x13   : > { %v265_v6 = vld [vmem:[%s3923_s25 + $0xc1] sm:$0xff]  ;;  %v281_v7 = vpack.c.bf16 %v250_v5, %v249_v4  ;;  %v266_v8 = vld [vmem:[%s3923_s25 + $0xc9] sm:$0xff]  ;;  %v267_v13 = vld [vmem:[%s3923_s25 + $0xd9] sm:$0xff] }
  0x14   : > { %v252_v10 = vld [vmem:[%s3923_s25 + $0x21] sm:$0xff]  ;;  %v3931_v11 = vpack.c.bf16 %v266_v8, %v265_v6  ;;  %v253_v16 = vld [vmem:[%s3923_s25 + $0x31] sm:$0xff]  ;;  %v254_v19 = vld [vmem:[%s3923_s25 + $0x39] sm:$0xff]  ;;  %v1415_v8 = vsel %vm348_vm0, %v3962_v25, 0 }
  0x15   : > { %v3933_v12 = vpack.c.bf16 %v252_v10, %v251_v9  ;;  %v268_v14 = vld [vmem:[%s3923_s25 + $0xe1] sm:$0xff]  ;;  %3500 = vmatprep.mubr.msk.bf16.mxu0 %vm299_vm1, %v281_v7  ;;  %v269_v20 = vld [vmem:[%s3923_s25 + $0xf1] sm:$0xff]  ;;  %v270_v21 = vld [vmem:[%s3923_s25 + $0xf9] sm:$0xff]  ;;  %v3950_v22 = vpack.c.bf16 %v254_v19, %v253_v16  ;;  %v1121_v10 = vsel %vm348_vm0, %v3957_v24, 0 }
  0x16   : > { %v3940_v17 = vpack.c.bf16 %v268_v14, %v267_v13  ;;  %3516 = vmatprep.mubr.msk.bf16.mxu1 %vm299_vm1, %v3931_v11  ;;  %v3952_v23 = vpack.c.bf16 %v270_v21, %v269_v20  ;;  %v255_v26 = vld [vmem:[%s3923_s25 + $0x49] sm:$0xff]  ;;  %v256_v27 = vld [vmem:[%s3923_s25 + $0x51] sm:$0xff]  ;;  %v257_v30 = vld [vmem:[%s3923_s25 + $0x61] sm:$0xff] }
  0x17   : > { %3501 = vmatmul.mubr.msk.bf16.vlgmr.msra.gmra.mxu0 %vm299_vm1, %v3933_v12  ;;  %v271_v28 = vld [vmem:[%s3923_s25 + $0x109] sm:$0xff]  ;;  %v272_v29 = vld [vmem:[%s3923_s25 + $0x111] sm:$0xff]  ;;  %v273_v32 = vld [vmem:[%s3923_s25 + $0x121] sm:$0xff]  ;;  %v3980_v34 = vpack.c.bf16 %v256_v27, %v255_v26 }
  0x18   : > { %3517 = vmatmul.mubr.msk.bf16.vlgmr.msra.gmra.mxu1 %vm299_vm1, %v3940_v17  ;;  %3567 = vmatpush3.bf16.msra.mxu0 %v824_v15  ;;  %v258_v31 = vld [vmem:[%s3923_s25 + $0x69] sm:$0xff]  ;;  %v3984_v35 = vpack.c.bf16 %v272_v29, %v271_v28  ;;  %v259_v38 = vld [vmem:[%s3923_s25 + $0x79] sm:$0xff]  ;;  %v260_v39 = vld [vmem:[%s3923_s25 + $0x81] sm:$0xff] }
  0x19   : > { %3533 = vmatpush3.bf16.msra.mxu1 %v562_v18  ;;  %3504 = vmatprep.mubr.msk.bf16.mxu0 %vm299_vm1, %v3950_v22  ;;  %v274_v33 = vld [vmem:[%s3923_s25 + $0x129] sm:$0xff]  ;;  %v3986_v36 = vpack.c.bf16 %v258_v31, %v257_v30  ;;  %v275_v40 = vld [vmem:[%s3923_s25 + $0x139] sm:$0xff]  ;;  %v276_v41 = vld [vmem:[%s3923_s25 + $0x141] sm:$0xff]  ;;  %v4006_v46 = vpack.c.bf16 %v260_v39, %v259_v38 }
  0x1a   : > { %3520 = vmatprep.mubr.msk.bf16.mxu1 %vm299_vm1, %v3952_v23  ;;  %3810 = vmatprep.subr.msk.bf16.mxu1 %vm348_vm0, %v3957_v24  ;;  %v3988_v37 = vpack.c.bf16 %v274_v33, %v273_v32  ;;  %v261_v42 = vld [vmem:[%s3923_s25 + $0x91] sm:$0xff]  ;;  %v262_v43 = vld [vmem:[%s3923_s25 + $0x99] sm:$0xff]  ;;  %v4008_v47 = vpack.c.bf16 %v276_v41, %v275_v40  ;;  %v263_v50 = vld [vmem:[%s3923_s25 + $0xa9] sm:$0xff] }
  0x1b   : > { %3811 = vmatprep.subr.msk.bf16.mxu0 %vm348_vm0, %v3962_v25  ;;  %v277_v44 = vld [vmem:[%s3923_s25 + $0x151] sm:$0xff]  ;;  %v278_v45 = vld [vmem:[%s3923_s25 + $0x159] sm:$0xff]  ;;  %v4010_v48 = vpack.c.bf16 %v262_v43, %v261_v42  ;;  %v279_v52 = vld [vmem:[%s3923_s25 + $0x169] sm:$0xff] }
  0x1c   : > { %v4012_v49 = vpack.c.bf16 %v278_v45, %v277_v44  ;;  %v264_v51 = vld [vmem:[%s3923_s25 + $0xb1] sm:$0xff]  ;;  %v725_v54 = vld [vmem:[%s3923_s25 + $0x2] sm:$0xff]  ;;  %v727_v62 = vld [vmem:[%s3923_s25 + $0x1a] sm:$0xff] }
  0x1d   : > { %v280_v53 = vld [vmem:[%s3923_s25 + $0x171] sm:$0xff]  ;;  %v200_v56 = vld [vmem:[%s3923_s25] sm:$0xff]  ;;  %v201_v57 = vld [vmem:[%s3923_s25 + $0x8] sm:$0xff]  ;;  %v4030_v58 = vpack.c.bf16 %v264_v51, %v263_v50 }
  0x1e   : > { %v726_v55 = vld [vmem:[%s3923_s25 + $0xa] sm:$0xff]  ;;  %v4032_v59 = vpack.c.bf16 %v280_v53, %v279_v52  ;;  %v232_v61 = vpack.c.bf16 %v201_v57, %v200_v56  ;;  %v728_v63 = vld [vmem:[%s3923_s25 + $0x22] sm:$0xff]  ;;  %v202_v0 = vld [vmem:[%s3923_s25 + $0x18] sm:$0xff] }
  0x1f   : > { %3505 = vmatmul.mubr.msk.bf16.gmra.mxu0 %vm299_vm1, %v3980_v34  ;;  %v757_v60 = vpack.c.bf16 %v726_v55, %v725_v54  ;;  %v203_v1 = vld [vmem:[%s3923_s25 + $0x20] sm:$0xff]  ;;  %v204_v2 = vld [vmem:[%s3923_s25 + $0x30] sm:$0xff]  ;;  %v205_v3 = vld [vmem:[%s3923_s25 + $0x38] sm:$0xff]  ;;  %v4046_v4 = vpack.c.bf16 %v728_v63, %v727_v62 }
  0x20   : > { %3521 = vmatmul.mubr.msk.bf16.gmra.mxu1 %vm299_vm1, %v3984_v35  ;;  %3508 = vmatprep.mubr.msk.bf16.mxu0 %vm299_vm1, %v3986_v36  ;;  %v729_v5 = vld [vmem:[%s3923_s25 + $0x32] sm:$0xff]  ;;  %v730_v6 = vld [vmem:[%s3923_s25 + $0x3a] sm:$0xff]  ;;  %v4050_v7 = vpack.c.bf16 %v203_v1, %v202_v0  ;;  %v4054_v9 = vpack.c.bf16 %v205_v3, %v204_v2  ;;  %v4065_v14 = vld [vmem:[%s5013_s1 + $0xa] sm:$0x3] }
  0x21   : > { %3524 = vmatprep.mubr.msk.bf16.mxu1 %vm299_vm1, %v3988_v37  ;;  %v4058_v13 = vpack.c.bf16 %v730_v6, %v729_v5  ;;  %v4070_v15 = vld [vmem:[%s5013_s1 + $0xc] sm:$0x3]  ;;  %v732_v19 = vld [vmem:[%s3923_s25 + $0x52] sm:$0xff]  ;;  %v733_v21 = vld [vmem:[%s3923_s25 + $0x62] sm:$0xff] }
  0x22   : > { %v206_v16 = vld [vmem:[%s3923_s25 + $0x48] sm:$0xff]  ;;  %v207_v20 = vld [vmem:[%s3923_s25 + $0x50] sm:$0xff]  ;;  %v208_v25 = vld [vmem:[%s3923_s25 + $0x60] sm:$0xff] }
  0x23   : > { %v731_v18 = vld [vmem:[%s3923_s25 + $0x4a] sm:$0xff]  ;;  %v4092_v28 = vpack.c.bf16 %v207_v20, %v206_v16  ;;  %v210_v31 = vld [vmem:[%s3923_s25 + $0x78] sm:$0xff]  ;;  %v736_v33 = vld [vmem:[%s3923_s25 + $0x82] sm:$0xff] }
  0x24   : > { %v734_v24 = vld [vmem:[%s3923_s25 + $0x6a] sm:$0xff]  ;;  %v4088_v27 = vpack.c.bf16 %v732_v19, %v731_v18  ;;  %v735_v32 = vld [vmem:[%s3923_s25 + $0x7a] sm:$0xff]  ;;  %v737_v39 = vld [vmem:[%s3923_s25 + $0x92] sm:$0xff] }
  0x25   : > { %v209_v26 = vld [vmem:[%s3923_s25 + $0x68] sm:$0xff]  ;;  %v4094_v29 = vpack.c.bf16 %v734_v24, %v733_v21  ;;  %v211_v38 = vld [vmem:[%s3923_s25 + $0x80] sm:$0xff]  ;;  %v212_v41 = vld [vmem:[%s3923_s25 + $0x90] sm:$0xff]  ;;  %v4114_v43 = vpack.c.bf16 %v736_v33, %v735_v32 }
  0x26   : > { %v4096_v30 = vpack.c.bf16 %v209_v26, %v208_v25  ;;  %v738_v40 = vld [vmem:[%s3923_s25 + $0x9a] sm:$0xff]  ;;  %v4116_v44 = vpack.c.bf16 %v211_v38, %v210_v31  ;;  %v214_v51 = vld [vmem:[%s3923_s25 + $0xa8] sm:$0xff]  ;;  %v740_v53 = vld [vmem:[%s3923_s25 + $0xb2] sm:$0xff] }
  0x27   : > { %3509 = vmatmul.mubr.msk.bf16.gmra.mxu0 %vm299_vm1, %v4006_v46  ;;  %v213_v42 = vld [vmem:[%s3923_s25 + $0x98] sm:$0xff]  ;;  %v4118_v45 = vpack.c.bf16 %v738_v40, %v737_v39  ;;  %v739_v52 = vld [vmem:[%s3923_s25 + $0xaa] sm:$0xff]  ;;  %v741_v55 = vld [vmem:[%s3923_s25 + $0xc2] sm:$0xff] }
  0x28   : > { %3525 = vmatmul.mubr.msk.bf16.gmra.mxu1 %vm299_vm1, %v4008_v47  ;;  %3512 = vmatprep.mubr.msk.bf16.mxu0 %vm299_vm1, %v4010_v48  ;;  %v4120_v50 = vpack.c.bf16 %v213_v42, %v212_v41  ;;  %v215_v54 = vld [vmem:[%s3923_s25 + $0xb0] sm:$0xff]  ;;  %v216_v57 = vld [vmem:[%s3923_s25 + $0xc0] sm:$0xff]  ;;  %v218_v1 = vld [vmem:[%s3923_s25 + $0xd8] sm:$0xff] }
  0x29   : > { %3528 = vmatprep.mubr.msk.bf16.mxu1 %vm299_vm1, %v4012_v49  ;;  %v742_v56 = vld [vmem:[%s3923_s25 + $0xca] sm:$0xff]  ;;  %v4140_v62 = vpack.c.bf16 %v215_v54, %v214_v51  ;;  %v743_v2 = vld [vmem:[%s3923_s25 + $0xda] sm:$0xff]  ;;  %v744_v3 = vld [vmem:[%s3923_s25 + $0xe2] sm:$0xff] }
  0x2a   : > { %v4142_v63 = vpack.c.bf16 %v742_v56, %v741_v55  ;;  %v219_v5 = vld [vmem:[%s3923_s25 + $0xe0] sm:$0xff]  ;;  %v745_v6 = vld [vmem:[%s3923_s25 + $0xf2] sm:$0xff]  ;;  %v4162_v18 = vpack.c.bf16 %v744_v3, %v743_v2  ;;  %v222_v24 = vld [vmem:[%s3923_s25 + $0x108] sm:$0xff] }
  0x2b   : > { %v221_v16 = vld [vmem:[%s3923_s25 + $0xf8] sm:$0xff]  ;;  %v4164_v19 = vpack.c.bf16 %v219_v5, %v218_v1  ;;  %v747_v25 = vld [vmem:[%s3923_s25 + $0x10a] sm:$0xff]  ;;  %v749_v32 = vld [vmem:[%s3923_s25 + $0x122] sm:$0xff] }
  0x2c   : > { %v748_v26 = vld [vmem:[%s3923_s25 + $0x112] sm:$0xff]  ;;  %v750_v33 = vld [vmem:[%s3923_s25 + $0x12a] sm:$0xff]  ;;  %v224_v38 = vld [vmem:[%s3923_s25 + $0x120] sm:$0xff] }
  0x2d   : > { %v223_v31 = vld [vmem:[%s3923_s25 + $0x110] sm:$0xff]  ;;  %v225_v39 = vld [vmem:[%s3923_s25 + $0x128] sm:$0xff]  ;;  %v4186_v40 = vpack.c.bf16 %v748_v26, %v747_v25  ;;  %v4190_v42 = vpack.c.bf16 %v750_v33, %v749_v32  ;;  %v227_v55 = vld [vmem:[%s3923_s25 + $0x140] sm:$0xff]  ;;  %v1709_v32 = vsel %vm348_vm0, %v4065_v14, 0 }
  0x2e   : > { %v4188_v41 = vpack.c.bf16 %v223_v31, %v222_v24  ;;  %v4192_v51 = vpack.c.bf16 %v225_v39, %v224_v38  ;;  %v752_v54 = vld [vmem:[%s3923_s25 + $0x142] sm:$0xff]  ;;  %v753_v56 = vld [vmem:[%s3923_s25 + $0x152] sm:$0xff]  ;;  %v2006_v31 = vsel %vm348_vm0, %v4070_v15, 0  ;;  %v3275_v33 = vld [vmem:[%s5013_s1 + $0xe] sm:$0x3] }
  0x2f   : > { %3513 = vmatmul.mubr.msk.bf16.gmra.mxu0 %vm299_vm1, %v4030_v58  ;;  %v229_v1 = vld [vmem:[%s3923_s25 + $0x158] sm:$0xff]  ;;  %v231_v24 = vld [vmem:[%s3923_s25 + $0x170] sm:$0xff] }
  0x30   : > { %3529 = vmatmul.mubr.msk.bf16.gmra.mxu1 %vm299_vm1, %v4032_v59  ;;  %3568 = vmatprep.mubr.msk.bf16.mxu0 %vm299_vm1, %v757_v60  ;;  %v217_v60 = vld [vmem:[%s3923_s25 + $0xc8] sm:$0xff] }
  0x31   : > { %3534 = vmatprep.mubr.msk.bf16.mxu1 %vm299_vm1, %v232_v61  ;;  %v4138_v61 = vpack.c.bf16 %v740_v53, %v739_v52  ;;  %v4144_v0 = vpack.c.bf16 %v217_v60, %v216_v57  ;;  %v226_v52 = vld [vmem:[%s3923_s25 + $0x138] sm:$0xff]  ;;  %v228_v60 = vld [vmem:[%s3923_s25 + $0x150] sm:$0xff] }
  0x32   : > { %v751_v53 = vld [vmem:[%s3923_s25 + $0x13a] sm:$0xff]  ;;  %v4212_v3 = vpack.c.bf16 %v227_v55, %v226_v52  ;;  %v3176_v55 = vld [vmem:[%s3923_s25 + $0x18a] sm:$0xff] }
  0x33   : > { %v754_v57 = vld [vmem:[%s3923_s25 + $0x15a] sm:$0xff]  ;;  %v4210_v2 = vpack.c.bf16 %v752_v54, %v751_v53  ;;  %v3175_v54 = vld [vmem:[%s3923_s25 + $0x182] sm:$0xff] }
  0x34   : > { %v4214_v5 = vpack.c.bf16 %v754_v57, %v753_v56  ;;  %v3225_v52 = vld [vmem:[%s3923_s25 + $0x1a0] sm:$0xff] }
  0x37   : > { %3569 = vmatmul.mubr.msk.bf16.vlgmr.msra.gmra.mxu0 %vm299_vm1, %v4046_v4 }
  0x38   : > { %3535 = vmatmul.mubr.msk.bf16.vlgmr.msra.gmra.mxu1 %vm299_vm1, %v4050_v7  ;;  %3635 = vmatpush3.bf16.msra.mxu0 %v1415_v8  ;;  %v746_v8 = vld [vmem:[%s3923_s25 + $0xfa] sm:$0xff] }
  0x39   : > { %3601 = vmatpush3.bf16.msra.mxu1 %v1121_v10  ;;  %3538 = vmatprep.mubr.msk.bf16.mxu1 %vm299_vm1, %v4054_v9  ;;  %v220_v10 = vld [vmem:[%s3923_s25 + $0xf0] sm:$0xff]  ;;  %v4166_v20 = vpack.c.bf16 %v746_v8, %v745_v6  ;;  %v4216_v6 = vpack.c.bf16 %v229_v1, %v228_v60 }
  0x3a   : > { %3572 = vmatprep.mubr.msk.bf16.mxu0 %vm299_vm1, %v4058_v13  ;;  %3812 = vmatprep.subr.msk.bf16.mxu1 %vm348_vm0, %v4065_v14  ;;  %v4168_v21 = vpack.c.bf16 %v221_v16, %v220_v10  ;;  %v755_v8 = vld [vmem:[%s3923_s25 + $0x16a] sm:$0xff]  ;;  %v756_v10 = vld [vmem:[%s3923_s25 + $0x172] sm:$0xff] }
  0x3b   : > { %3813 = vmatprep.subr.msk.bf16.mxu0 %vm348_vm0, %v4070_v15  ;;  %v230_v16 = vld [vmem:[%s3923_s25 + $0x168] sm:$0xff]  ;;  %v4230_v25 = vpack.c.bf16 %v756_v10, %v755_v8 }
  0x3c   : > { %v4232_v26 = vpack.c.bf16 %v231_v24, %v230_v16 }
  0x3f   : > { %3573 = vmatmul.mubr.msk.bf16.gmra.mxu0 %vm299_vm1, %v4088_v27 }
  0x40   : > { %3539 = vmatmul.mubr.msk.bf16.gmra.mxu1 %vm299_vm1, %v4092_v28  ;;  %3576 = vmatprep.mubr.msk.bf16.mxu0 %vm299_vm1, %v4094_v29 }
  0x41   : > { %3542 = vmatprep.mubr.msk.bf16.mxu1 %vm299_vm1, %v4096_v30 }
  0x47   : > { %3577 = vmatmul.mubr.msk.bf16.gmra.mxu0 %vm299_vm1, %v4114_v43 }
  0x48   : > { %3543 = vmatmul.mubr.msk.bf16.gmra.mxu1 %vm299_vm1, %v4116_v44  ;;  %3580 = vmatprep.mubr.msk.bf16.mxu0 %vm299_vm1, %v4118_v45 }
  0x49   : > { %3546 = vmatprep.mubr.msk.bf16.mxu1 %vm299_vm1, %v4120_v50 }
  0x4f   : > { %3581 = vmatmul.mubr.msk.bf16.gmra.mxu0 %vm299_vm1, %v4138_v61 }
  0x50   : > { %3547 = vmatmul.mubr.msk.bf16.gmra.mxu1 %vm299_vm1, %v4140_v62  ;;  %3584 = vmatprep.mubr.msk.bf16.mxu0 %vm299_vm1, %v4142_v63 }
  0x51   : > { %3550 = vmatprep.mubr.msk.bf16.mxu1 %vm299_vm1, %v4144_v0 }
  0x57   : > { %3585 = vmatmul.mubr.msk.bf16.gmra.mxu0 %vm299_vm1, %v4162_v18 }
  0x58   : > { %3551 = vmatmul.mubr.msk.bf16.gmra.mxu1 %vm299_vm1, %v4164_v19  ;;  %3588 = vmatprep.mubr.msk.bf16.mxu0 %vm299_vm1, %v4166_v20 }
  0x59   : > { %3554 = vmatprep.mubr.msk.bf16.mxu1 %vm299_vm1, %v4168_v21 }
  0x5f   : > { %3589 = vmatmul.mubr.msk.bf16.gmra.mxu0 %vm299_vm1, %v4186_v40 }
  0x60   : > { %3555 = vmatmul.mubr.msk.bf16.gmra.mxu1 %vm299_vm1, %v4188_v41  ;;  %3592 = vmatprep.mubr.msk.bf16.mxu0 %vm299_vm1, %v4190_v42 }
  0x61   : > { %3558 = vmatprep.mubr.msk.bf16.mxu1 %vm299_vm1, %v4192_v51 }
  0x67   : > { %3593 = vmatmul.mubr.msk.bf16.gmra.mxu0 %vm299_vm1, %v4210_v2 }
  0x68   : > { %3559 = vmatmul.mubr.msk.bf16.gmra.mxu1 %vm299_vm1, %v4212_v3  ;;  %3596 = vmatprep.mubr.msk.bf16.mxu0 %vm299_vm1, %v4214_v5 }
  0x69   : > { %3562 = vmatprep.mubr.msk.bf16.mxu1 %vm299_vm1, %v4216_v6 }
  0x6f   : > { %3597 = vmatmul.mubr.msk.bf16.gmra.mxu0 %vm299_vm1, %v4230_v25 }
  0x70   : > { %3563 = vmatmul.mubr.msk.bf16.gmra.mxu1 %vm299_vm1, %v4232_v26  ;;  %3636 = vmatprep.mubr.msk.bf16.mxu0 %vm299_vm1, %v3933_v12  ;;  %v3324_v12 = vld [vmem:[%s5013_s1 + $0x10] sm:$0x3] }
  0x71   : > { %3602 = vmatprep.mubr.msk.bf16.mxu1 %vm299_vm1, %v4050_v7 }
  0x77   : > { %3637 = vmatmul.mubr.msk.bf16.vlgmr.msra.gmra.mxu0 %vm299_vm1, %v3950_v22 }
  0x78   : > { %3603 = vmatmul.mubr.msk.bf16.vlgmr.msra.gmra.mxu1 %vm299_vm1, %v4054_v9  ;;  %3703 = vmatpush3.bf16.msra.mxu0 %v2006_v31 }
  0x79   : > { %3669 = vmatpush3.bf16.msra.mxu1 %v1709_v32  ;;  %3606 = vmatprep.mubr.msk.bf16.mxu1 %vm299_vm1, %v4092_v28 }
  0x7a   : > { %3640 = vmatprep.mubr.msk.bf16.mxu0 %vm299_vm1, %v3980_v34  ;;  %3814 = vmatprep.subr.msk.bf16.mxu1 %vm348_vm0, %v3275_v33 }
  0x7b   : > { %3815 = vmatprep.subr.msk.bf16.mxu0 %vm348_vm0, %v3324_v12 }
  0x7f   : > { %3641 = vmatmul.mubr.msk.bf16.gmra.mxu0 %vm299_vm1, %v3986_v36 }
  0x80   : > { %3607 = vmatmul.mubr.msk.bf16.gmra.mxu1 %vm299_vm1, %v4096_v30  ;;  %3644 = vmatprep.mubr.msk.bf16.mxu0 %vm299_vm1, %v4006_v46 }
  0x81   : > { %3610 = vmatprep.mubr.msk.bf16.mxu1 %vm299_vm1, %v4116_v44 }
  0x87   : > { %3645 = vmatmul.mubr.msk.bf16.gmra.mxu0 %vm299_vm1, %v4010_v48  ;;  %v2594_v48 = vsel %vm348_vm0, %v3324_v12, 0 }
  0x88   : > { %3611 = vmatmul.mubr.msk.bf16.gmra.mxu1 %vm299_vm1, %v4120_v50  ;;  %3648 = vmatprep.mubr.msk.bf16.mxu0 %vm299_vm1, %v4030_v58 }
  0x89   : > { %3614 = vmatprep.mubr.msk.bf16.mxu1 %vm299_vm1, %v4140_v62 }
  0x8f   : > { %3649 = vmatmul.mubr.msk.bf16.gmra.mxu0 %vm299_vm1, %v3931_v11  ;;  %v3126_v11 = vld [vmem:[%s3923_s25 + $0x181] sm:$0xff] }
  0x90   : > { %3615 = vmatmul.mubr.msk.bf16.gmra.mxu1 %vm299_vm1, %v4144_v0  ;;  %3652 = vmatprep.mubr.msk.bf16.mxu0 %vm299_vm1, %v3940_v17  ;;  %v3127_v17 = vld [vmem:[%s3923_s25 + $0x189] sm:$0xff] }
  0x91   : > { %3618 = vmatprep.mubr.msk.bf16.mxu1 %vm299_vm1, %v4164_v19 }
  0x97   : > { %3653 = vmatmul.mubr.msk.bf16.gmra.mxu0 %vm299_vm1, %v3952_v23  ;;  %v3077_v23 = vld [vmem:[%s3923_s25 + $0x180] sm:$0xff] }
  0x98   : > { %3619 = vmatmul.mubr.msk.bf16.gmra.mxu1 %vm299_vm1, %v4168_v21  ;;  %3656 = vmatprep.mubr.msk.bf16.mxu0 %vm299_vm1, %v3984_v35  ;;  %v3078_v35 = vld [vmem:[%s3923_s25 + $0x188] sm:$0xff] }
  0x99   : > { %3622 = vmatprep.mubr.msk.bf16.mxu1 %vm299_vm1, %v4188_v41 }
  0x9f   : > { %3657 = vmatmul.mubr.msk.bf16.gmra.mxu0 %vm299_vm1, %v3988_v37  ;;  %v4314_v37 = vpack.c.bf16 %v3127_v17, %v3126_v11 }
  0xa0   : > { %3623 = vmatmul.mubr.msk.bf16.gmra.mxu1 %vm299_vm1, %v4192_v51  ;;  %3660 = vmatprep.mubr.msk.bf16.mxu0 %vm299_vm1, %v4008_v47  ;;  %v1069_v47 = vpack.c.bf16 %v3078_v35, %v3077_v23  ;;  %v3251_v23 = vld [vmem:[%s3923_s25 + $0x91] sm:$0xff]  ;;  %v3252_v35 = vld [vmem:[%s3923_s25 + $0x99] sm:$0xff] }
  0xa1   : > { %3626 = vmatprep.mubr.msk.bf16.mxu1 %vm299_vm1, %v4212_v3 }
  0xa7   : > { %3661 = vmatmul.mubr.msk.bf16.gmra.mxu0 %vm299_vm1, %v4012_v49  ;;  %v2300_v49 = vsel %vm348_vm0, %v3275_v33, 0 }
  0xa8   : > { %3627 = vmatmul.mubr.msk.bf16.gmra.mxu1 %vm299_vm1, %v4216_v6  ;;  %3664 = vmatprep.mubr.msk.bf16.mxu0 %vm299_vm1, %v4032_v59 }
  0xa9   : > { %3630 = vmatprep.mubr.msk.bf16.mxu1 %vm299_vm1, %v4232_v26 }
  0xaf   : > { %3665 = vmatmul.mubr.msk.bf16.gmra.mxu0 %vm299_vm1, %v4314_v37 }
  0xb0   : > { %3631 = vmatmul.mubr.msk.bf16.gmra.mxu1 %vm299_vm1, %v1069_v47  ;;  %3704 = vmatprep.mubr.msk.bf16.mxu0 %vm299_vm1, %v4054_v9 }
  0xb1   : > { %3670 = vmatprep.mubr.msk.bf16.mxu1 %vm299_vm1, %v4046_v4 }
  0xb7   : > { %3705 = vmatmul.mubr.msk.bf16.vlgmr.msra.gmra.mxu0 %vm299_vm1, %v4092_v28 }
  0xb8   : > { %3671 = vmatmul.mubr.msk.bf16.vlgmr.msra.gmra.mxu1 %vm299_vm1, %v4058_v13  ;;  %3771 = vmatpush3.bf16.msra.mxu0 %v2594_v48 }
  0xb9   : > { %3737 = vmatpush3.bf16.msra.mxu1 %v2300_v49  ;;  %3674 = vmatprep.mubr.msk.bf16.mxu1 %vm299_vm1, %v4088_v27 }
  0xba   : > { %3708 = vmatprep.mubr.msk.bf16.mxu0 %vm299_vm1, %v4096_v30 }
  0xbf   : > { %3709 = vmatmul.mubr.msk.bf16.gmra.mxu0 %vm299_vm1, %v4116_v44 }
  0xc0   : > { %3675 = vmatmul.mubr.msk.bf16.gmra.mxu1 %vm299_vm1, %v4094_v29  ;;  %3712 = vmatprep.mubr.msk.bf16.mxu0 %vm299_vm1, %v4120_v50 }
  0xc1   : > { %3678 = vmatprep.mubr.msk.bf16.mxu1 %vm299_vm1, %v4114_v43 }
  0xc7   : > { %3713 = vmatmul.mubr.msk.bf16.gmra.mxu0 %vm299_vm1, %v4140_v62 }
  0xc8   : > { %3679 = vmatmul.mubr.msk.bf16.gmra.mxu1 %vm299_vm1, %v4118_v45  ;;  %3716 = vmatprep.mubr.msk.bf16.mxu0 %vm299_vm1, %v4144_v0 }
  0xc9   : > { %3682 = vmatprep.mubr.msk.bf16.mxu1 %vm299_vm1, %v4138_v61 }
  0xcf   : > { %3717 = vmatmul.mubr.msk.bf16.gmra.mxu0 %vm299_vm1, %v4164_v19 }
  0xd0   : > { %3683 = vmatmul.mubr.msk.bf16.gmra.mxu1 %vm299_vm1, %v4142_v63  ;;  %3720 = vmatprep.mubr.msk.bf16.mxu0 %vm299_vm1, %v4168_v21 }
  0xd1   : > { %3686 = vmatprep.mubr.msk.bf16.mxu1 %vm299_vm1, %v4162_v18 }
  0xd7   : > { %v3502_v58 = vpop.f32.mrf.mxu0  ;;  %3721 = vmatmul.mubr.msk.bf16.gmra.mxu0 %vm299_vm1, %v4188_v41 }
  0xd8   : > { %v4359_v59 = vpop.f32.mrf.mxu1  ;;  %3687 = vmatmul.mubr.msk.bf16.gmra.mxu1 %vm299_vm1, %v4166_v20  ;;  %3724 = vmatprep.mubr.msk.bf16.mxu0 %vm299_vm1, %v4192_v51  ;;  %v3224_v51 = vld [vmem:[%s3923_s25 + $0x198] sm:$0xff] }
  0xd9   : > { %v386_v4 = vpop.f32.mrf.mxu0  ;;  %3690 = vmatprep.mubr.msk.bf16.mxu1 %vm299_vm1, %v4186_v40  ;;  %v1954_v60 = vpack.c.bf16 %v3225_v52, %v3224_v51 }
  0xda   : > { %v4367_v7 = vpop.f32.mrf.mxu1 }
  0xdb   : > { %v3503_v9 = vpop.f32.mrf.mxu0 }
  0xdc   : > { %v4369_v14 = vpop.f32.mrf.mxu1 }
  0xdd   : > { %v4371_v15 = vpop.f32.mrf.mxu0 }
  0xde   : > { %v4373_v28 = vpop.f32.mrf.mxu1 }
  0xdf   : > { %v4375_v30 = vpop.f32.mrf.mxu0  ;;  %3725 = vmatmul.mubr.msk.bf16.gmra.mxu0 %vm299_vm1, %v4212_v3  ;;  %v4422_v3 = vpack.c.bf16 %v3176_v55, %v3175_v54 }
  0xe0   : > { %v4379_v44 = vpop.f32.mrf.mxu1  ;;  %3691 = vmatmul.mubr.msk.bf16.gmra.mxu1 %vm299_vm1, %v4190_v42  ;;  %3728 = vmatprep.mubr.msk.bf16.mxu0 %vm299_vm1, %v4216_v6 }
  0xe1   : > { %v4385_v50 = vpop.f32.mrf.mxu0  ;;  %3694 = vmatprep.mubr.msk.bf16.mxu1 %vm299_vm1, %v4210_v2 }
  0xe2   : > { %v4389_v62 = vpop.f32.mrf.mxu1 }
  0xe3   : > { %v4391_v0 = vpop.f32.mrf.mxu0 }
  0xe4   : > { %v4393_v19 = vpop.f32.mrf.mxu1 }
  0xe5   : > { %v4395_v21 = vpop.f32.mrf.mxu0 }
  0xe6   : > { %v4397_v38 = vpop.f32.mrf.mxu1 }
  0xe7   : > { %v4399_v39 = vpop.f32.mrf.mxu0  ;;  %3729 = vmatmul.mubr.msk.bf16.gmra.mxu0 %vm299_vm1, %v4232_v26 }
  0xe8   : > { %v4403_v41 = vpop.f32.mrf.mxu1  ;;  %3695 = vmatmul.mubr.msk.bf16.gmra.mxu1 %vm299_vm1, %v4214_v5  ;;  %3732 = vmatprep.mubr.msk.bf16.mxu0 %vm299_vm1, %v1069_v47 }
  0xe9   : > { %v4410_v53 = vpop.f32.mrf.mxu0  ;;  %3698 = vmatprep.mubr.msk.bf16.mxu1 %vm299_vm1, %v4230_v25 }
  0xea   : > { %v4416_v56 = vpop.f32.mrf.mxu1 }
  0xeb   : > { %v4418_v57 = vpop.f32.mrf.mxu0 }
  0xec   : > { %v4420_v1 = vpop.f32.mrf.mxu1 }
  0xed   : > { %v4424_v6 = vpop.f32.mrf.mxu0 }
  0xee   : > { %v4426_v8 = vpop.f32.mrf.mxu1 }
  0xef   : > { %v4428_v10 = vpop.f32.mrf.mxu0  ;;  %3733 = vmatmul.mubr.msk.bf16.gmra.mxu0 %vm299_vm1, %v1954_v60 }
  0xf0   : > { %v4431_v16 = vpop.f32.mrf.mxu1  ;;  %3699 = vmatmul.mubr.msk.bf16.gmra.mxu1 %vm299_vm1, %v4422_v3  ;;  %3772 = vmatprep.mubr.msk.bf16.mxu0 %vm299_vm1, %v4058_v13 }
  0xf1   : > { %v4437_v24 = vpop.f32.mrf.mxu0  ;;  %3738 = vmatprep.mubr.msk.bf16.mxu1 %vm299_vm1, %v3950_v22 }
  0xf2   : > { %v4441_v25 = vpop.f32.mrf.mxu1 }
  0xf3   : > { %v4443_v26 = vpop.f32.mrf.mxu0 }
  0xf4   : > { %v4445_v31 = vpop.f32.mrf.mxu1 }
  0xf5   : > { %v4447_v32 = vpop.f32.mrf.mxu0 }
  0xf6   : > { %v4449_v33 = vpop.f32.mrf.mxu1 }
  0xf7   : > { %v3570_v12 = vpop.f32.mrf.mxu0  ;;  %3773 = vmatmul.mubr.msk.bf16.vlgmr.msra.gmra.mxu0 %vm299_vm1, %v4088_v27 }
  0xf8   : > { %v3536_v13 = vpop.f32.mrf.mxu1  ;;  %3739 = vmatmul.mubr.msk.bf16.vlgmr.msra.gmra.mxu1 %vm299_vm1, %v3980_v34  ;;  %3776 = vmatprep.mubr.msk.bf16.mxu0 %vm299_vm1, %v4094_v29  ;;  %v2237_v29 = vpack.c.bf16 %v3252_v35, %v3251_v23 }
  0xf9   : > { %v607_v22 = vadd.f32 %v3536_v13, %v3502_v58  ;;  %v860_v11 = vpop.f32.mrf.mxu0  ;;  %3742 = vmatprep.mubr.msk.bf16.mxu1 %vm299_vm1, %v3986_v36  ;;  %v3253_v13 = vld [vmem:[%s3923_s25 + $0xa9] sm:$0xff] }
  0xfa   : > { %v598_v17 = vpop.f32.mrf.mxu1 }
  0xfb   : > { %v4461_v47 = vadd.f32 %v3570_v12, %v607_v22  ;;  %v599_v48 = vadd.f32 %v598_v17, %v386_v4  ;;  %v3571_v49 = vpop.f32.mrf.mxu0  ;;  %v3256_v17 = vld [vmem:[%s3923_s25 + $0xc9] sm:$0xff] }
  0xfc   : > { %v3537_v27 = vpop.f32.mrf.mxu1 }
  0xfd   : > { %v4463_v51 = vadd.f32 %v860_v11, %v599_v48  ;;  %v610_v34 = vadd.f32 %v3537_v27, %v3503_v9  ;;  %v863_v52 = vpop.f32.mrf.mxu0  ;;  %v3255_v11 = vld [vmem:[%s3923_s25 + $0xc1] sm:$0xff] }
  0xfe   : > { %v601_v58 = vpop.f32.mrf.mxu1  ;;  %v2239_v27 = vpack.c.bf16 %v3256_v17, %v3255_v11 }
  0xff   : > { %v4465_v54 = vadd.f32 %v3571_v49, %v610_v34  ;;  %v602_v36 = vadd.f32 %v601_v58, %v4371_v15  ;;  %v3574_v55 = vpop.f32.mrf.mxu0  ;;  %3777 = vmatmul.mubr.msk.bf16.gmra.mxu0 %vm299_vm1, %v4114_v43  ;;  %v3254_v15 = vld [vmem:[%s3923_s25 + $0xb1] sm:$0xff] }
 0x100   : > { %v3540_v4 = vpop.f32.mrf.mxu1  ;;  %3743 = vmatmul.mubr.msk.bf16.gmra.mxu1 %vm299_vm1, %v4006_v46  ;;  %3780 = vmatprep.mubr.msk.bf16.mxu0 %vm299_vm1, %v4118_v45  ;;  %v2238_v48 = vpack.c.bf16 %v3254_v15, %v3253_v13  ;;  %v3260_v13 = vld [vmem:[%s3923_s25 + $0xf9] sm:$0xff] }
 0x101   : > { %v4474_v9 = vadd.f32 %v863_v52, %v602_v36  ;;  %v623_v60 = vadd.f32 %v3540_v4, %v4375_v30  ;;  %v876_v12 = vpop.f32.mrf.mxu0  ;;  %3746 = vmatprep.mubr.msk.bf16.mxu1 %vm299_vm1, %v2237_v29  ;;  %v3257_v4 = vld [vmem:[%s3923_s25 + $0xd9] sm:$0xff] }
 0x102   : > { %v614_v22 = vpop.f32.mrf.mxu1 }
 0x103   : > { %v4482_v43 = vadd.f32 %v3574_v55, %v623_v60  ;;  %v615_v23 = vadd.f32 %v614_v22, %v4385_v50  ;;  %v3575_v46 = vpop.f32.mrf.mxu0  ;;  %v3258_v60 = vld [vmem:[%s3923_s25 + $0xe1] sm:$0xff] }
 0x104   : > { %v3541_v35 = vpop.f32.mrf.mxu1  ;;  %v2240_v17 = vpack.c.bf16 %v3258_v60, %v3257_v4 }
 0x105   : > { %v4485_v45 = vadd.f32 %v876_v12, %v615_v23  ;;  %v626_v30 = vadd.f32 %v3541_v35, %v4391_v0  ;;  %v879_v49 = vpop.f32.mrf.mxu0  ;;  %v3259_v12 = vld [vmem:[%s3923_s25 + $0xf1] sm:$0xff] }
 0x106   : > { %v617_v34 = vpop.f32.mrf.mxu1 }
 0x107   : > { %v4488_v52 = vadd.f32 %v3575_v46, %v626_v30  ;;  %v618_v29 = vadd.f32 %v617_v34, %v4395_v21  ;;  %v3578_v58 = vpop.f32.mrf.mxu0  ;;  %3781 = vmatmul.mubr.msk.bf16.gmra.mxu0 %vm299_vm1, %v4138_v61  ;;  %v2241_v46 = vpack.c.bf16 %v3260_v13, %v3259_v12 }
 0x108   : > { %v3544_v50 = vpop.f32.mrf.mxu1  ;;  %3747 = vmatmul.mubr.msk.bf16.gmra.mxu1 %vm299_vm1, %v2238_v48  ;;  %3784 = vmatprep.mubr.msk.bf16.mxu0 %vm299_vm1, %v4142_v63 }
 0x109   : > { %v4496_v0 = vadd.f32 %v879_v49, %v618_v29  ;;  %v639_v36 = vadd.f32 %v3544_v50, %v4399_v39  ;;  %v892_v55 = vpop.f32.mrf.mxu0  ;;  %3750 = vmatprep.mubr.msk.bf16.mxu1 %vm299_vm1, %v2239_v27  ;;  %v3261_v29 = vld [vmem:[%s3923_s25 + $0x109] sm:$0xff]  ;;  %v3263_v50 = vld [vmem:[%s3923_s25 + $0x121] sm:$0xff] }
 0x10a   : > { %v630_v21 = vpop.f32.mrf.mxu1 }
 0x10b   : > { %v4504_v15 = vadd.f32 %v3578_v58, %v639_v36  ;;  %v631_v61 = vadd.f32 %v630_v21, %v4410_v53  ;;  %v3579_v22 = vpop.f32.mrf.mxu0  ;;  %v3262_v58 = vld [vmem:[%s3923_s25 + $0x111] sm:$0xff]  ;;  %v3264_v36 = vld [vmem:[%s3923_s25 + $0x129] sm:$0xff] }
 0x10c   : > { %v3545_v11 = vpop.f32.mrf.mxu1  ;;  %v2242_v21 = vpack.c.bf16 %v3262_v58, %v3261_v29  ;;  %v2243_v13 = vpack.c.bf16 %v3264_v36, %v3263_v50 }
 0x10d   : > { %v4507_v63 = vadd.f32 %v892_v55, %v631_v61  ;;  %v642_v39 = vadd.f32 %v3545_v11, %v4418_v57  ;;  %v895_v23 = vpop.f32.mrf.mxu0 }
 0x10e   : > { %v633_v35 = vpop.f32.mrf.mxu1 }
 0x10f   : > { %v4510_v48 = vadd.f32 %v3579_v22, %v642_v39  ;;  %v634_v30 = vadd.f32 %v633_v35, %v4424_v6  ;;  %v3582_v49 = vpop.f32.mrf.mxu0  ;;  %3785 = vmatmul.mubr.msk.bf16.gmra.mxu0 %vm299_vm1, %v4162_v18  ;;  %v3266_v35 = vld [vmem:[%s3923_s25 + $0x141] sm:$0xff] }
 0x110   : > { %v3548_v53 = vpop.f32.mrf.mxu1  ;;  %3751 = vmatmul.mubr.msk.bf16.gmra.mxu1 %vm299_vm1, %v2240_v17  ;;  %3788 = vmatprep.mubr.msk.bf16.mxu0 %vm299_vm1, %v4166_v20 }
 0x111   : > { %v4518_v57 = vadd.f32 %v895_v23, %v634_v30  ;;  %v655_v27 = vadd.f32 %v3548_v53, %v4428_v10  ;;  %v908_v34 = vpop.f32.mrf.mxu0  ;;  %3754 = vmatprep.mubr.msk.bf16.mxu1 %vm299_vm1, %v2241_v46  ;;  %v3265_v46 = vld [vmem:[%s3923_s25 + $0x139] sm:$0xff]  ;;  %v3267_v30 = vld [vmem:[%s3923_s25 + $0x151] sm:$0xff] }
 0x112   : > { %v646_v6 = vpop.f32.mrf.mxu1 }
 0x113   : > { %v4526_v55 = vadd.f32 %v3582_v49, %v655_v27  ;;  %v647_v18 = vadd.f32 %v646_v6, %v4437_v24  ;;  %v3583_v4 = vpop.f32.mrf.mxu0  ;;  %v3268_v49 = vld [vmem:[%s3923_s25 + $0x159] sm:$0xff] }
 0x114   : > { %v3549_v60 = vpop.f32.mrf.mxu1  ;;  %v2245_v6 = vpack.c.bf16 %v3268_v49, %v3267_v30 }
 0x115   : > { %v4529_v20 = vadd.f32 %v908_v34, %v647_v18  ;;  %v658_v10 = vadd.f32 %v3549_v60, %v4443_v26  ;;  %v911_v12 = vpop.f32.mrf.mxu0  ;;  %v2244_v34 = vpack.c.bf16 %v3266_v35, %v3265_v46  ;;  %v3319_v60 = vld [vmem:[%s3923_s25 + $0x172] sm:$0xff] }
 0x116   : > { %v649_v61 = vpop.f32.mrf.mxu1 }
 0x117   : > { %v4532_v22 = vadd.f32 %v3583_v4, %v658_v10  ;;  %v650_v11 = vadd.f32 %v649_v61, %v4447_v32  ;;  %v3586_v17 = vpop.f32.mrf.mxu0  ;;  %3789 = vmatmul.mubr.msk.bf16.gmra.mxu0 %vm299_vm1, %v4186_v40 }
 0x118   : > { %v3552_v24 = vpop.f32.mrf.mxu1  ;;  %3755 = vmatmul.mubr.msk.bf16.gmra.mxu1 %vm299_vm1, %v2242_v21  ;;  %3792 = vmatprep.mubr.msk.bf16.mxu0 %vm299_vm1, %v4190_v42 }
 0x119   : > { %v4540_v26 = vadd.f32 %v911_v12, %v650_v11  ;;  %v671_v39 = vadd.f32 %v3552_v24, %v4359_v59  ;;  %v924_v23 = vpop.f32.mrf.mxu0  ;;  %3758 = vmatprep.mubr.msk.bf16.mxu1 %vm299_vm1, %v2243_v13  ;;  %v3270_v13 = vld [vmem:[%s3923_s25 + $0x171] sm:$0xff] }
 0x11a   : > { %v662_v32 = vpop.f32.mrf.mxu1 }
 0x11b   : > { %v4548_v53 = vadd.f32 %v3586_v17, %v671_v39  ;;  %v663_v40 = vadd.f32 %v662_v32, %v4367_v7  ;;  %v3587_v27 = vpop.f32.mrf.mxu0 }
 0x11c   : > { %v3553_v42 = vpop.f32.mrf.mxu1 }
 0x11d   : > { %v4551_v29 = vadd.f32 %v924_v23, %v663_v40  ;;  %v674_v59 = vadd.f32 %v3553_v42, %v4369_v14  ;;  %v927_v58 = vpop.f32.mrf.mxu0  ;;  %v3318_v14 = vld [vmem:[%s3923_s25 + $0x16a] sm:$0xff]  ;;  %v3322_v40 = vld [vmem:[%s3923_s25 + $0x19a] sm:$0xff] }
 0x11e   : > { %v665_v50 = vpop.f32.mrf.mxu1 }
 0x11f   : > { %v4554_v36 = vadd.f32 %v3587_v27, %v674_v59  ;;  %v666_v18 = vadd.f32 %v665_v50, %v4373_v28  ;;  %v3590_v4 = vpop.f32.mrf.mxu0  ;;  %3793 = vmatmul.mubr.msk.bf16.gmra.mxu0 %vm299_vm1, %v4210_v2  ;;  %v3269_v28 = vld [vmem:[%s3923_s25 + $0x169] sm:$0xff]  ;;  %v3274_v59 = vld [vmem:[%s3923_s25 + $0x1a1] sm:$0xff] }
 0x120   : > { %v3556_v7 = vpop.f32.mrf.mxu1  ;;  %3759 = vmatmul.mubr.msk.bf16.gmra.mxu1 %vm299_vm1, %v2244_v34  ;;  %3796 = vmatprep.mubr.msk.bf16.mxu0 %vm299_vm1, %v4214_v5  ;;  %v2540_v5 = vpack.c.bf16 %v3319_v60, %v3318_v14  ;;  %v2246_v39 = vpack.c.bf16 %v3270_v13, %v3269_v28  ;;  %v3323_v27 = vld [vmem:[%s3923_s25 + $0x1a2] sm:$0xff] }
 0x121   : > { %v4564_v21 = vadd.f32 %v927_v58, %v666_v18  ;;  %v687_v10 = vadd.f32 %v3556_v7, %v4379_v44  ;;  %v940_v12 = vpop.f32.mrf.mxu0  ;;  %3762 = vmatprep.mubr.msk.bf16.mxu1 %vm299_vm1, %v2245_v6 }
 0x122   : > { %v678_v61 = vpop.f32.mrf.mxu1 }
 0x123   : > { %v4570_v11 = vadd.f32 %v3590_v4, %v687_v10  ;;  %v679_v2 = vadd.f32 %v678_v61, %v4389_v62  ;;  %v3591_v17 = vpop.f32.mrf.mxu0  ;;  %v2542_v4 = vpack.c.bf16 %v3323_v27, %v3322_v40 }
 0x124   : > { %v3557_v24 = vpop.f32.mrf.mxu1 }
 0x125   : > { %v4573_v23 = vadd.f32 %v940_v12, %v679_v2  ;;  %v690_v44 = vadd.f32 %v3557_v24, %v4393_v19  ;;  %v943_v46 = vpop.f32.mrf.mxu0 }
 0x126   : > { %v681_v35 = vpop.f32.mrf.mxu1 }
 0x127   : > { %v4576_v32 = vadd.f32 %v3591_v17, %v690_v44  ;;  %v682_v30 = vadd.f32 %v681_v35, %v4397_v38  ;;  %v3594_v49 = vpop.f32.mrf.mxu0  ;;  %3797 = vmatmul.mubr.msk.bf16.gmra.mxu0 %vm299_vm1, %v2540_v5  ;;  %v3273_v38 = vld [vmem:[%s3923_s25 + $0x199] sm:$0xff] }
 0x128   : > { %v3560_v62 = vpop.f32.mrf.mxu1  ;;  %3763 = vmatmul.mubr.msk.bf16.gmra.mxu1 %vm299_vm1, %v2246_v39  ;;  %3800 = vmatprep.mubr.msk.bf16.mxu0 %vm299_vm1, %v4422_v3  ;;  %v2248_v7 = vpack.c.bf16 %v3274_v59, %v3273_v38 }
 0x129   : > { %v4585_v19 = vadd.f32 %v943_v46, %v682_v30  ;;  %v703_v42 = vadd.f32 %v3560_v62, %v4403_v41  ;;  %v956_v34 = vpop.f32.mrf.mxu0  ;;  %3766 = vmatprep.mubr.msk.bf16.mxu1 %vm299_vm1, %v4314_v37 }
 0x12a   : > { %v694_v58 = vpop.f32.mrf.mxu1 }
 0x12b   : > { %v4592_v6 = vadd.f32 %v3594_v49, %v703_v42  ;;  %v695_v50 = vadd.f32 %v694_v58, %v4416_v56  ;;  %v3595_v18 = vpop.f32.mrf.mxu0 }
 0x12c   : > { %v3561_v3 = vpop.f32.mrf.mxu1 }
 0x12d   : > { %v4595_v14 = vadd.f32 %v956_v34, %v695_v50  ;;  %v706_v60 = vadd.f32 %v3561_v3, %v4420_v1  ;;  %v959_v41 = vpop.f32.mrf.mxu0 }
 0x12e   : > { %v697_v10 = vpop.f32.mrf.mxu1 }
 0x12f   : > { %v4598_v12 = vadd.f32 %v3595_v18, %v706_v60  ;;  %v698_v37 = vadd.f32 %v697_v10, %v4426_v8  ;;  %v3598_v28 = vpop.f32.mrf.mxu0  ;;  %3801 = vmatmul.mubr.msk.bf16.gmra.mxu0 %vm299_vm1, %v2542_v4 }
 0x130   : > { %v3564_v13 = vpop.f32.mrf.mxu1  ;;  %3767 = vmatmul.mubr.msk.bf16.gmra.mxu1 %vm299_vm1, %v2248_v7 }
 0x131   : > { %v4603_v56 = vadd.f32 %v959_v41, %v698_v37  ;;  %v719_v61 = vadd.f32 %v3564_v13, %v4431_v16  ;;  %v972_v2 = vpop.f32.mrf.mxu0 }
 0x132   : > { %v710_v17 = vpop.f32.mrf.mxu1 }
 0x133   : > { %v4606_v5 = vadd.f32 %v3598_v28, %v719_v61  ;;  %v711_v1 = vadd.f32 %v710_v17, %v4441_v25  ;;  %v3599_v24 = vpop.f32.mrf.mxu0 }
 0x134   : > { %v3565_v39 = vpop.f32.mrf.mxu1 }
 0x135   : > { %v4609_v44 = vadd.f32 %v972_v2, %v711_v1  ;;  %v722_v8 = vadd.f32 %v3565_v39, %v4445_v31  ;;  %v975_v46 = vpop.f32.mrf.mxu0 }
 0x136   : > { %v713_v35 = vpop.f32.mrf.mxu1 }
 0x137   : > { %v4612_v30 = vadd.f32 %v3599_v24, %v722_v8  ;;  %v714_v49 = vadd.f32 %v713_v35, %v4449_v33  ;;  %v3638_v62 = vpop.f32.mrf.mxu0 }
 0x138   : > { %v3604_v16 = vpop.f32.mrf.mxu1 }
 0x139   : > { %v4615_v40 = vadd.f32 %v975_v46, %v714_v49  ;;  %v1286_v27 = vadd.f32 %v3604_v16, %v4461_v47  ;;  %v1451_v42 = vpop.f32.mrf.mxu0 }
 0x13a   : > { %v1157_v25 = vpop.f32.mrf.mxu1 }
 0x13b   : > { %v4618_v34 = vadd.f32 %v3638_v62, %v1286_v27  ;;  %v1284_v38 = vadd.f32 %v1157_v25, %v4463_v51  ;;  %v3639_v59 = vpop.f32.mrf.mxu0 }
 0x13c   : > { %v3605_v31 = vpop.f32.mrf.mxu1 }
 0x13d   : > { %v4621_v58 = vadd.f32 %v1451_v42, %v1284_v38  ;;  %v1287_v50 = vadd.f32 %v3605_v31, %v4465_v54  ;;  %v1454_v18 = vpop.f32.mrf.mxu0 }
 0x13e   : > { %v1160_v33 = vpop.f32.mrf.mxu1 }
 0x13f   : > { %v4624_v4 = vadd.f32 %v3639_v59, %v1287_v50  ;;  %v1285_v3 = vadd.f32 %v1160_v33, %v4474_v9  ;;  %v3642_v7 = vpop.f32.mrf.mxu0 }
 0x140   : > { %v3608_v47 = vpop.f32.mrf.mxu1 }
 0x141   : > { %v4627_v60 = vadd.f32 %v1454_v18, %v1285_v3  ;;  %v1290_v41 = vadd.f32 %v3608_v47, %v4482_v43  ;;  %v1467_v10 = vpop.f32.mrf.mxu0 }
 0x142   : > { %v1173_v51 = vpop.f32.mrf.mxu1 }
 0x143   : > { %v4630_v37 = vadd.f32 %v3642_v7, %v1290_v41  ;;  %v1288_v28 = vadd.f32 %v1173_v51, %v4485_v45  ;;  %v3643_v13 = vpop.f32.mrf.mxu0 }
 0x144   : > { %v3609_v54 = vpop.f32.mrf.mxu1 }
 0x145   : > { %v4633_v61 = vadd.f32 %v1467_v10, %v1288_v28  ;;  %v1291_v2 = vadd.f32 %v3609_v54, %v4488_v52  ;;  %v1470_v17 = vpop.f32.mrf.mxu0 }
 0x146   : > { %v1176_v9 = vpop.f32.mrf.mxu1 }
 0x147   : > { %v4636_v1 = vadd.f32 %v3643_v13, %v1291_v2  ;;  %v1289_v24 = vadd.f32 %v1176_v9, %v4496_v0  ;;  %v3646_v39 = vpop.f32.mrf.mxu0 }
 0x148   : > { %v3612_v43 = vpop.f32.mrf.mxu1 }
 0x149   : > { %v4639_v8 = vadd.f32 %v1470_v17, %v1289_v24  ;;  %v1294_v46 = vadd.f32 %v3612_v43, %v4504_v15  ;;  %v1483_v35 = vpop.f32.mrf.mxu0 }
 0x14a   : > { %v1189_v45 = vpop.f32.mrf.mxu1 }
 0x14b   : > { %v4642_v49 = vadd.f32 %v3646_v39, %v1294_v46  ;;  %v1292_v62 = vadd.f32 %v1189_v45, %v4507_v63  ;;  %v3647_v16 = vpop.f32.mrf.mxu0 }
 0x14c   : > { %v3613_v52 = vpop.f32.mrf.mxu1 }
 0x14d   : > { %v4645_v27 = vadd.f32 %v1483_v35, %v1292_v62  ;;  %v1295_v42 = vadd.f32 %v3613_v52, %v4510_v48  ;;  %v1486_v25 = vpop.f32.mrf.mxu0 }
 0x14e   : > { %v1192_v0 = vpop.f32.mrf.mxu1 }
 0x14f   : > { %v4648_v38 = vadd.f32 %v3647_v16, %v1295_v42  ;;  %v1293_v59 = vadd.f32 %v1192_v0, %v4518_v57  ;;  %v3650_v31 = vpop.f32.mrf.mxu0 }
 0x150   : > { %v3616_v15 = vpop.f32.mrf.mxu1 }
 0x151   : > { %v4651_v50 = vadd.f32 %v1486_v25, %v1293_v59  ;;  %v1298_v18 = vadd.f32 %v3616_v15, %v4526_v55  ;;  %v1499_v33 = vpop.f32.mrf.mxu0 }
 0x152   : > { %v1205_v63 = vpop.f32.mrf.mxu1 }
 0x153   : > { %v4654_v3 = vadd.f32 %v3650_v31, %v1298_v18  ;;  %v1296_v7 = vadd.f32 %v1205_v63, %v4529_v20  ;;  %v3651_v47 = vpop.f32.mrf.mxu0 }
 0x154   : > { %v3617_v48 = vpop.f32.mrf.mxu1 }
 0x155   : > { %v4657_v41 = vadd.f32 %v1499_v33, %v1296_v7  ;;  %v1299_v10 = vadd.f32 %v3617_v48, %v4532_v22  ;;  %v1502_v51 = vpop.f32.mrf.mxu0 }
 0x156   : > { %v1208_v57 = vpop.f32.mrf.mxu1 }
 0x157   : > { %v4660_v28 = vadd.f32 %v3651_v47, %v1299_v10  ;;  %v1297_v13 = vadd.f32 %v1208_v57, %v4540_v26  ;;  %v3654_v54 = vpop.f32.mrf.mxu0 }
 0x158   : > { %v3620_v55 = vpop.f32.mrf.mxu1 }
 0x159   : > { %v4663_v2 = vadd.f32 %v1502_v51, %v1297_v13  ;;  %v1302_v17 = vadd.f32 %v3620_v55, %v4548_v53  ;;  %v1515_v9 = vpop.f32.mrf.mxu0 }
 0x15a   : > { %v1221_v20 = vpop.f32.mrf.mxu1 }
 0x15b   : > { %v4666_v24 = vadd.f32 %v3654_v54, %v1302_v17  ;;  %v1300_v39 = vadd.f32 %v1221_v20, %v4551_v29  ;;  %v3655_v43 = vpop.f32.mrf.mxu0 }
 0x15c   : > { %v3621_v22 = vpop.f32.mrf.mxu1 }
 0x15d   : > { %v4669_v46 = vadd.f32 %v1515_v9, %v1300_v39  ;;  %v1303_v35 = vadd.f32 %v3621_v22, %v4554_v36  ;;  %v1518_v45 = vpop.f32.mrf.mxu0 }
 0x15e   : > { %v1224_v26 = vpop.f32.mrf.mxu1 }
 0x15f   : > { %v4672_v62 = vadd.f32 %v3655_v43, %v1303_v35  ;;  %v1301_v16 = vadd.f32 %v1224_v26, %v4564_v21  ;;  %v3658_v52 = vpop.f32.mrf.mxu0 }
 0x160   : > { %v3624_v53 = vpop.f32.mrf.mxu1 }
 0x161   : > { %5016 = vst [vmem:[#allocation2_spill] sm:$0xff] %v4672_v62  ;;  %v4675_v42 = vadd.f32 %v1518_v45, %v1301_v16  ;;  %v1306_v25 = vadd.f32 %v3624_v53, %v4570_v11  ;;  %v1531_v0 = vpop.f32.mrf.mxu0 }
 0x162   : > { %v1237_v29 = vpop.f32.mrf.mxu1 }
 0x163   : > { %5017 = vst [vmem:[#allocation3_spill] sm:$0xff] %v4675_v42  ;;  %v4678_v59 = vadd.f32 %v3658_v52, %v1306_v25  ;;  %v1304_v31 = vadd.f32 %v1237_v29, %v4573_v23  ;;  %v3659_v15 = vpop.f32.mrf.mxu0 }
 0x164   : > { %v3625_v36 = vpop.f32.mrf.mxu1 }
 0x165   : > { %5018 = vst [vmem:[#allocation4_spill] sm:$0xff] %v4678_v59  ;;  %v4681_v18 = vadd.f32 %v1531_v0, %v1304_v31  ;;  %v1307_v33 = vadd.f32 %v3625_v36, %v4576_v32  ;;  %v1534_v63 = vpop.f32.mrf.mxu0 }
 0x166   : > { %v1240_v21 = vpop.f32.mrf.mxu1 }
 0x167   : > { %5019 = vst [vmem:[#allocation5_spill] sm:$0xff] %v4681_v18  ;;  %v4684_v7 = vadd.f32 %v3659_v15, %v1307_v33  ;;  %v1305_v47 = vadd.f32 %v1240_v21, %v4585_v19  ;;  %v3662_v48 = vpop.f32.mrf.mxu0 }
 0x168   : > { %v3628_v11 = vpop.f32.mrf.mxu1 }
 0x169   : > { %5020 = vst [vmem:[#allocation6_spill] sm:$0xff] %v4684_v7  ;;  %v4687_v10 = vadd.f32 %v1534_v63, %v1305_v47  ;;  %v1310_v51 = vadd.f32 %v3628_v11, %v4592_v6  ;;  %v1547_v57 = vpop.f32.mrf.mxu0 }
 0x16a   : > { %v1253_v23 = vpop.f32.mrf.mxu1 }
 0x16b   : > { %5021 = vst [vmem:[#allocation7_spill] sm:$0xff] %v4687_v10  ;;  %v4690_v13 = vadd.f32 %v3662_v48, %v1310_v51  ;;  %v1308_v54 = vadd.f32 %v1253_v23, %v4595_v14  ;;  %v3663_v55 = vpop.f32.mrf.mxu0 }
 0x16c   : > { %v3629_v32 = vpop.f32.mrf.mxu1 }
 0x16d   : > { %5022 = vst [vmem:[#allocation8_spill] sm:$0xff] %v4690_v13  ;;  %v4693_v17 = vadd.f32 %v1547_v57, %v1308_v54  ;;  %v1311_v9 = vadd.f32 %v3629_v32, %v4598_v12  ;;  %v1550_v20 = vpop.f32.mrf.mxu0 }
 0x16e   : > { %v1256_v19 = vpop.f32.mrf.mxu1 }
 0x16f   : > { %5023 = vst [vmem:[#allocation9_spill] sm:$0xff] %v4693_v17  ;;  %v4696_v39 = vadd.f32 %v3663_v55, %v1311_v9  ;;  %v1309_v43 = vadd.f32 %v1256_v19, %v4603_v56  ;;  %v3666_v22 = vpop.f32.mrf.mxu0 }
 0x170   : > { %v3632_v6 = vpop.f32.mrf.mxu1 }
 0x171   : > { %5024 = vst [vmem:[#allocation10_spill] sm:$0xff] %v4696_v39  ;;  %v4699_v35 = vadd.f32 %v1550_v20, %v1309_v43  ;;  %v1314_v45 = vadd.f32 %v3632_v6, %v4606_v5  ;;  %v1563_v26 = vpop.f32.mrf.mxu0 }
 0x172   : > { %v1269_v14 = vpop.f32.mrf.mxu1 }
 0x173   : > { %5025 = vst [vmem:[#allocation11_spill] sm:$0xff] %v4699_v35  ;;  %v4702_v16 = vadd.f32 %v3666_v22, %v1314_v45  ;;  %v1312_v52 = vadd.f32 %v1269_v14, %v4609_v44  ;;  %v3667_v53 = vpop.f32.mrf.mxu0 }
 0x174   : > { %v3633_v12 = vpop.f32.mrf.mxu1 }
 0x175   : > { %5026 = vst [vmem:[#allocation12_spill] sm:$0xff] %v4702_v16  ;;  %v4705_v25 = vadd.f32 %v1563_v26, %v1312_v52  ;;  %v1315_v0 = vadd.f32 %v3633_v12, %v4612_v30  ;;  %v1566_v29 = vpop.f32.mrf.mxu0 }
 0x176   : > { %v1272_v56 = vpop.f32.mrf.mxu1 }
 0x177   : > { %5027 = vst [vmem:[#allocation13_spill] sm:$0xff] %v4705_v25  ;;  %v4708_v31 = vadd.f32 %v3667_v53, %v1315_v0  ;;  %v1313_v15 = vadd.f32 %v1272_v56, %v4615_v40  ;;  %v4711_v36 = vpop.f32.mrf.mxu0 }
 0x178   : > { %v3672_v5 = vpop.f32.mrf.mxu1 }
 0x179   : > { %5028 = vst [vmem:[#allocation14_spill] sm:$0xff] %v4708_v31  ;;  %v4713_v33 = vadd.f32 %v1566_v29, %v1313_v15  ;;  %v4715_v63 = vpop.f32.mrf.mxu0 }
 0x17a   : > { %v1745_v44 = vpop.f32.mrf.mxu1 }
 0x17b   : > { %5029 = vst [vmem:[#allocation15_spill] sm:$0xff] %v4713_v33  ;;  %v4717_v21 = vpop.f32.mrf.mxu0 }
 0x17c   : > { %v3673_v47 = vpop.f32.mrf.mxu1 }
 0x17d   : > { %v4719_v48 = vpop.f32.mrf.mxu0 }
 0x17e   : > { %v4721_v30 = vpop.f32.mrf.mxu1 }
 0x17f   : > { %v4723_v11 = vpop.f32.mrf.mxu0 }
 0x180   : > { %v4725_v51 = vpop.f32.mrf.mxu1 }
 0x181   : > { %v4727_v40 = vpop.f32.mrf.mxu0 }
 0x182   : > { %v4729_v57 = vpop.f32.mrf.mxu1 }
 0x183   : > { %v4731_v23 = vpop.f32.mrf.mxu0 }
 0x184   : > { %v4733_v54 = vpop.f32.mrf.mxu1 }
 0x185   : > { %v4735_v55 = vpop.f32.mrf.mxu0 }
 0x186   : > { %v4737_v32 = vpop.f32.mrf.mxu1 }
 0x187   : > { %v4739_v9 = vpop.f32.mrf.mxu0 }
 0x188   : > { %v4741_v20 = vpop.f32.mrf.mxu1 }
 0x189   : > { %v4743_v19 = vpop.f32.mrf.mxu0 }
 0x18a   : > { %v4745_v43 = vpop.f32.mrf.mxu1 }
 0x18b   : > { %v4747_v22 = vpop.f32.mrf.mxu0 }
 0x18c   : > { %v4749_v6 = vpop.f32.mrf.mxu1 }
 0x18d   : > { %v4751_v45 = vpop.f32.mrf.mxu0 }
 0x18e   : > { %v4753_v26 = vpop.f32.mrf.mxu1 }
 0x18f   : > { %v4755_v14 = vpop.f32.mrf.mxu0 }
 0x190   : > { %v4757_v52 = vpop.f32.mrf.mxu1 }
 0x191   : > { %v4759_v53 = vpop.f32.mrf.mxu0 }
 0x192   : > { %v4761_v12 = vpop.f32.mrf.mxu1 }
 0x193   : > { %v4763_v0 = vpop.f32.mrf.mxu0 }
 0x194   : > { %v4765_v29 = vpop.f32.mrf.mxu1 }
 0x195   : > { %v4767_v56 = vpop.f32.mrf.mxu0 }
 0x196   : > { %v4769_v15 = vpop.f32.mrf.mxu1 }
 0x197   : > { %v4771_v33 = vpop.f32.mrf.mxu0 }
 0x198   : > { %v4773_v31 = vpop.f32.mrf.mxu1 }
 0x199   : > { %v4775_v25 = vpop.f32.mrf.mxu0 }
 0x19a   : > { %5030 = vst [vmem:[#allocation16_spill] sm:$0xff] %v4775_v25  ;;  %v4777_v16 = vpop.f32.mrf.mxu1 }
 0x19b   : > { %v4779_v35 = vpop.f32.mrf.mxu0 }
 0x19c   : > { %5031 = vst [vmem:[#allocation17_spill] sm:$0xff] %v4779_v35  ;;  %v4781_v39 = vpop.f32.mrf.mxu1 }
 0x19d   : > { %5032 = vst [vmem:[#allocation18_spill] sm:$0xff] %v4781_v39  ;;  %v4783_v17 = vpop.f32.mrf.mxu0 }
 0x19e   : > { %5033 = vst [vmem:[#allocation19_spill] sm:$0xff] %v4783_v17  ;;  %v4785_v13 = vpop.f32.mrf.mxu1 }
 0x19f   : > { %5034 = vst [vmem:[#allocation20_spill] sm:$0xff] %v4785_v13  ;;  %v4787_v10 = vpop.f32.mrf.mxu0 }
 0x1a0   : > { %5035 = vst [vmem:[#allocation21_spill] sm:$0xff] %v4787_v10  ;;  %v4789_v7 = vpop.f32.mrf.mxu1 }
 0x1a1   : > { %5036 = vst [vmem:[#allocation22_spill] sm:$0xff] %v4789_v7  ;;  %v4791_v18 = vpop.f32.mrf.mxu0 }
 0x1a2   : > { %5037 = vst [vmem:[#allocation23_spill] sm:$0xff] %v4791_v18  ;;  %v4793_v59 = vpop.f32.mrf.mxu1 }
 0x1a3   : > { %5038 = vst [vmem:[#allocation24_spill] sm:$0xff] %v4793_v59  ;;  %v4795_v42 = vpop.f32.mrf.mxu0 }
 0x1a4   : > { %5039 = vst [vmem:[#allocation25_spill] sm:$0xff] %v4795_v42  ;;  %v4797_v25 = vpop.f32.mrf.mxu1 }
 0x1a5   : > { %5040 = vst [vmem:[#allocation26_spill] sm:$0xff] %v4797_v25  ;;  %v4799_v62 = vpop.f32.mrf.mxu0 }
 0x1a6   : > { %5041 = vst [vmem:[#allocation27_spill] sm:$0xff] %v4799_v62  ;;  %v4801_v35 = vpop.f32.mrf.mxu1 }
 0x1a7   : > { %5042 = vst [vmem:[#allocation28_spill] sm:$0xff] %v4801_v35  ;;  %v4803_v39 = vpop.f32.mrf.mxu0 }
 0x1a8   : > { %5043 = vst [vmem:[#allocation29_spill] sm:$0xff] %v4803_v39  ;;  %v4805_v17 = vpop.f32.mrf.mxu1 }
 0x1a9   : > { %5044 = vst [vmem:[#allocation30_spill] sm:$0xff] %v4805_v17  ;;  %v4807_v13 = vpop.f32.mrf.mxu0 }
 0x1aa   : > { %5045 = vst [vmem:[#allocation31_spill] sm:$0xff] %v4807_v13  ;;  %v4809_v10 = vpop.f32.mrf.mxu1  ;;  %v1874_v13 = vadd.f32 %v3672_v5, %v4618_v34  ;;  %v1873_v34 = vadd.f32 %v4721_v30, %v4627_v60  ;;  %v1876_v60 = vadd.f32 %v4729_v57, %v4633_v61 }
 0x1ab   : > { %5046 = vst [vmem:[#allocation32_spill] sm:$0xff] %v4809_v10  ;;  %v4811_v7 = vpop.f32.mrf.mxu0 }
 0x1ac   : > { %5047 = vst [vmem:[#allocation33_spill] sm:$0xff] %v4811_v7  ;;  %v4813_v18 = vpop.f32.mrf.mxu1  ;;  %v1872_v7 = vadd.f32 %v1745_v44, %v4621_v58  ;;  %v1878_v58 = vadd.f32 %v4725_v51, %v4630_v37  ;;  %v4847_v44 = vld [vmem:[%s5014_s2] ss:$0 sm:$0xff]  ;;  %v2173_v57 = vadd.f32 %v4727_v40, %v1876_v60 }
 0x1ad   : > { %5048 = vst [vmem:[#allocation34_spill] sm:$0xff] %v4813_v18  ;;  %v4815_v59 = vpop.f32.mrf.mxu0 }
 0x1ae   : > { %5049 = vst [vmem:[#allocation35_spill] sm:$0xff] %v4815_v59  ;;  %v4817_v42 = vpop.f32.mrf.mxu1 }
 0x1af   : > { %5050 = vst [vmem:[#allocation36_spill] sm:$0xff] %v4817_v42  ;;  %v4819_v25 = vpop.f32.mrf.mxu0 }
 0x1b0   : > { %5051 = vst [vmem:[#allocation37_spill] sm:$0xff] %v4819_v25  ;;  %v4821_v62 = vpop.f32.mrf.mxu1  ;;  %v2171_v25 = vadd.f32 %v4711_v36, %v1874_v13 }
 0x1b1   : > { %5052 = vst [vmem:[#allocation38_spill] sm:$0xff] %v4821_v62  ;;  %v4823_v35 = vpop.f32.mrf.mxu0  ;;  %v1875_v62 = vadd.f32 %v3673_v47, %v4624_v4 }
 0x1b2   : > { %5053 = vst [vmem:[#allocation39_spill] sm:$0xff] %v4823_v35  ;;  %v4825_v39 = vpop.f32.mrf.mxu1 }
 0x1b3   : > { %5054 = vst [vmem:[#allocation40_spill] sm:$0xff] %v4825_v39  ;;  %v4828_v17 = vpop.f32.mrf.mxu0  ;;  %v2169_v39 = vadd.f32 %v4715_v63, %v1872_v7  ;;  %v2172_v4 = vadd.f32 %v4717_v21, %v1875_v62  ;;  %v1879_v62 = vadd.f32 %v4733_v54, %v4636_v1 }
 0x1b4   : > { %5055 = vst [vmem:[#allocation41_spill] sm:$0xff] %v4828_v17  ;;  %v4830_v10 = vpop.f32.mrf.mxu1 }
 0x1b5   : > { %v4833_v59 = vpop.f32.mrf.mxu0 }
 0x1b6   : > { %5056 = vst [vmem:[#allocation42_spill] sm:$0xff] %v4833_v59  ;;  %v4835_v42 = vpop.f32.mrf.mxu1  ;;  %v2175_v59 = vadd.f32 %v4723_v11, %v1878_v58  ;;  %v1877_v11 = vadd.f32 %v4737_v32, %v4639_v8 }
 0x1b7   : > { %v3774_v35 = vpop.f32.mrf.mxu0 }
 0x1b8   : > { %v3740_v18 = vpop.f32.mrf.mxu1 }
 0x1b9   : > { %v2465_v5 = vadd.f32 %v3740_v18, %v2171_v25  ;;  %v2630_v17 = vpop.f32.mrf.mxu0  ;;  %v2170_v25 = vadd.f32 %v4719_v48, %v1873_v34 }
 0x1ba   : > { %v2336_v13 = vpop.f32.mrf.mxu1 }
 0x1bb   : > { %v2759_v36 = vadd.f32 %v3774_v35, %v2465_v5  ;;  %v2463_v47 = vadd.f32 %v2336_v13, %v2169_v39  ;;  %v3775_v7 = vpop.f32.mrf.mxu0 }
 0x1bc   : > { %v3741_v18 = vpop.f32.mrf.mxu1 }
 0x1bd   : > { %v2798_v37 = vadd.f32 %v4847_v44, %v2759_v36  ;;  %v2757_v63 = vadd.f32 %v2630_v17, %v2463_v47  ;;  %v2466_v30 = vadd.f32 %v3741_v18, %v2172_v4  ;;  %v2633_v51 = vpop.f32.mrf.mxu0  ;;  %v2176_v4 = vadd.f32 %v4731_v23, %v1879_v62 }
 0x1be   : > { %v2339_v61 = vpop.f32.mrf.mxu1  ;;  %v1882_v36 = vadd.f32 %v4741_v20, %v4642_v49  ;;  %v2174_v18 = vadd.f32 %v4735_v55, %v1877_v11 }
 0x1bf   : > { %v2830_v39 = vmax.f32 %v2798_v37, 0.0  ;;  %v2796_v35 = vadd.f32 %v4847_v44, %v2757_v63  ;;  %v2760_v21 = vadd.f32 %v3775_v7, %v2466_v30  ;;  %v2464_v17 = vadd.f32 %v2339_v61, %v2170_v25  ;;  %v3778_v48 = vpop.f32.mrf.mxu0 }
 0x1c0   : > { %v3744_v1 = vpop.f32.mrf.mxu1  ;;  %v2179_v30 = vadd.f32 %v4739_v9, %v1882_v36 }
 0x1c1   : > { %2862 = vst [vmem:[%s4861_s19 + $0x10] sm:$0xff] %v2830_v39  ;;  %v2828_v54 = vmax.f32 %v2796_v35, 0.0  ;;  %v2799_v34 = vadd.f32 %v4847_v44, %v2760_v21  ;;  %v2758_v5 = vadd.f32 %v2633_v51, %v2464_v17  ;;  %v2469_v58 = vadd.f32 %v3744_v1, %v2175_v59  ;;  %v2646_v13 = vpop.f32.mrf.mxu0 }
 0x1c2   : > { %v2352_v47 = vpop.f32.mrf.mxu1  ;;  %v1880_v59 = vadd.f32 %v4745_v43, %v4645_v27  ;;  %v1883_v51 = vadd.f32 %v4749_v6, %v4648_v38  ;;  %v1881_v21 = vadd.f32 %v4753_v26, %v4651_v50  ;;  %v1886_v1 = vadd.f32 %v4757_v52, %v4654_v3 }
 0x1c3   : > { %2860 = vst [vmem:[%s4861_s19] sm:$0xff] %v2828_v54  ;;  %v2831_v40 = vmax.f32 %v2799_v34, 0.0  ;;  %v2797_v7 = vadd.f32 %v4847_v44, %v2758_v5  ;;  %v2763_v8 = vadd.f32 %v3778_v48, %v2469_v58  ;;  %v2467_v32 = vadd.f32 %v2352_v47, %v2173_v57  ;;  %v3779_v60 = vpop.f32.mrf.mxu0 }
 0x1c4   : > { %v3745_v25 = vpop.f32.mrf.mxu1  ;;  %v2177_v35 = vadd.f32 %v4743_v19, %v1880_v59  ;;  %v2180_v11 = vadd.f32 %v4747_v22, %v1883_v51  ;;  %v2178_v58 = vadd.f32 %v4751_v45, %v1881_v21  ;;  %v1885_v59 = vadd.f32 %v4769_v15, %v4663_v2  ;;  %v5058_v21 = vld [vmem:[#allocation18_spill] sm:$0xff] }
 0x1c5   : > { %2863 = vst [vmem:[%s4861_s19 + $0x18] sm:$0xff] %v2831_v40  ;;  %v2829_v23 = vmax.f32 %v2797_v7, 0.0  ;;  %v2802_v37 = vadd.f32 %v4847_v44, %v2763_v8  ;;  %v2761_v49 = vadd.f32 %v2646_v13, %v2467_v32  ;;  %v2470_v20 = vadd.f32 %v3745_v25, %v2176_v4  ;;  %v2649_v63 = vpop.f32.mrf.mxu0 }
 0x1c6   : > { %v2355_v62 = vpop.f32.mrf.mxu1  ;;  %v1884_v13 = vadd.f32 %v4761_v12, %v4657_v41  ;;  %v2183_v40 = vadd.f32 %v4755_v14, %v1886_v1  ;;  %v1887_v7 = vadd.f32 %v4765_v29, %v4660_v28  ;;  %v5061_v1 = vld [vmem:[#allocation20_spill] sm:$0xff] }
 0x1c7   : > { %2861 = vst [vmem:[%s4861_s19 + $0x8] sm:$0xff] %v2829_v23  ;;  %v2834_v55 = vmax.f32 %v2802_v37, 0.0  ;;  %v2800_v61 = vadd.f32 %v4847_v44, %v2761_v49  ;;  %v2764_v27 = vadd.f32 %v3779_v60, %v2470_v20  ;;  %v2468_v43 = vadd.f32 %v2355_v62, %v2174_v18  ;;  %v3782_v39 = vpop.f32.mrf.mxu0 }
 0x1c8   : > { %v3748_v17 = vpop.f32.mrf.mxu1  ;;  %v2181_v18 = vadd.f32 %v4759_v53, %v1884_v13  ;;  %v2184_v49 = vadd.f32 %v4763_v0, %v1887_v7  ;;  %v1890_v20 = vadd.f32 %v4773_v31, %v4666_v24  ;;  %v2182_v62 = vadd.f32 %v4767_v56, %v1885_v59 }
 0x1c9   : > { %2866 = vst [vmem:[%s4861_s19 + $0x30] sm:$0xff] %v2834_v55  ;;  %v2832_v9 = vmax.f32 %v2800_v61, 0.0  ;;  %v2803_v48 = vadd.f32 %v4847_v44, %v2764_v27  ;;  %v2762_v38 = vadd.f32 %v2649_v63, %v2468_v43  ;;  %v2473_v6 = vadd.f32 %v3748_v17, %v2179_v30  ;;  %v2662_v57 = vpop.f32.mrf.mxu0 }
 0x1ca   : > { %v2368_v54 = vpop.f32.mrf.mxu1  ;;  %v1888_v55 = vadd.f32 %v4777_v16, %v4669_v46 }
 0x1cb   : > { %2864 = vst [vmem:[%s4861_s19 + $0x20] sm:$0xff] %v2832_v9  ;;  %v2835_v19 = vmax.f32 %v2803_v48, 0.0  ;;  %v2801_v34 = vadd.f32 %v4847_v44, %v2762_v38  ;;  %v2767_v50 = vadd.f32 %v3782_v39, %v2473_v6  ;;  %v2471_v26 = vadd.f32 %v2368_v54, %v2177_v35  ;;  %v3783_v5 = vpop.f32.mrf.mxu0  ;;  %v5057_v35 = vld [vmem:[#allocation2_spill] sm:$0xff]  ;;  %v5059_v6 = vld [vmem:[#allocation16_spill] sm:$0xff] }
 0x1cc   : > { %v3749_v4 = vpop.f32.mrf.mxu1  ;;  %v2187_v39 = vadd.f32 %v4771_v33, %v1890_v20  ;;  %v1891_v17 = vadd.f32 %v5058_v21, %v5057_v35  ;;  %v5070_v20 = vld [vmem:[#allocation26_spill] sm:$0xff] }
 0x1cd   : > { %2867 = vst [vmem:[%s4861_s19 + $0x38] sm:$0xff] %v2835_v19  ;;  %v2833_v22 = vmax.f32 %v2801_v34, 0.0  ;;  %v2806_v36 = vadd.f32 %v4847_v44, %v2767_v50  ;;  %v2765_v3 = vadd.f32 %v2662_v57, %v2471_v26  ;;  %v2474_v52 = vadd.f32 %v3749_v4, %v2180_v11  ;;  %v2665_v47 = vpop.f32.mrf.mxu0  ;;  %v5060_v11 = vld [vmem:[#allocation3_spill] sm:$0xff]  ;;  %v5063_v4 = vld [vmem:[#allocation4_spill] sm:$0xff] }
 0x1ce   : > { %v2371_v8 = vpop.f32.mrf.mxu1  ;;  %v2185_v57 = vadd.f32 %v5059_v6, %v1888_v55  ;;  %v1889_v54 = vadd.f32 %v5061_v1, %v5060_v11  ;;  %v5071_v55 = vld [vmem:[#allocation23_spill] sm:$0xff] }
 0x1cf   : > { %2865 = vst [vmem:[%s4861_s19 + $0x28] sm:$0xff] %v2833_v22  ;;  %v2838_v45 = vmax.f32 %v2806_v36, 0.0  ;;  %v2804_v32 = vadd.f32 %v4847_v44, %v2765_v3  ;;  %v2768_v41 = vadd.f32 %v3783_v5, %v2474_v52  ;;  %v2472_v12 = vadd.f32 %v2371_v8, %v2178_v58  ;;  %v3786_v60 = vpop.f32.mrf.mxu0  ;;  %v5062_v58 = vld [vmem:[#allocation17_spill] sm:$0xff]  ;;  %v5064_v22 = vld [vmem:[#allocation22_spill] sm:$0xff] }
 0x1d0   : > { %v3752_v25 = vpop.f32.mrf.mxu1  ;;  %v2188_v13 = vadd.f32 %v5062_v58, %v1891_v17  ;;  %v1894_v36 = vadd.f32 %v5064_v22, %v5063_v4 }
 0x1d1   : > { %2870 = vst [vmem:[%s4861_s19 + $0x50] sm:$0xff] %v2838_v45  ;;  %v2836_v14 = vmax.f32 %v2804_v32, 0.0  ;;  %v2807_v23 = vadd.f32 %v4847_v44, %v2768_v41  ;;  %v2766_v28 = vadd.f32 %v2665_v47, %v2472_v12  ;;  %v2477_v29 = vadd.f32 %v3752_v25, %v2183_v40  ;;  %v2678_v37 = vpop.f32.mrf.mxu0  ;;  %v5065_v45 = vld [vmem:[#allocation19_spill] sm:$0xff]  ;;  %v5066_v41 = vld [vmem:[#allocation5_spill] sm:$0xff]  ;;  %v5067_v12 = vld [vmem:[#allocation24_spill] sm:$0xff] }
 0x1d2   : > { %v2384_v63 = vpop.f32.mrf.mxu1  ;;  %v2186_v32 = vadd.f32 %v5065_v45, %v1889_v54 }
 0x1d3   : > { %2868 = vst [vmem:[%s4861_s19 + $0x40] sm:$0xff] %v2836_v14  ;;  %v2839_v53 = vmax.f32 %v2807_v23, 0.0  ;;  %v2805_v30 = vadd.f32 %v4847_v44, %v2766_v28  ;;  %v2771_v2 = vadd.f32 %v3786_v60, %v2477_v29  ;;  %v2475_v15 = vadd.f32 %v2384_v63, %v2181_v18  ;;  %v3787_v51 = vpop.f32.mrf.mxu0  ;;  %v5068_v29 = vld [vmem:[#allocation21_spill] sm:$0xff] }
 0x1d4   : > { %v3753_v61 = vpop.f32.mrf.mxu1  ;;  %v1892_v60 = vadd.f32 %v5067_v12, %v5066_v41 }
 0x1d5   : > { %2871 = vst [vmem:[%s4861_s19 + $0x58] sm:$0xff] %v2839_v53  ;;  %v2837_v0 = vmax.f32 %v2805_v30, 0.0  ;;  %v2810_v27 = vadd.f32 %v4847_v44, %v2771_v2  ;;  %v2769_v24 = vadd.f32 %v2678_v37, %v2475_v15  ;;  %v2478_v31 = vadd.f32 %v3753_v61, %v2184_v49  ;;  %v2681_v43 = vpop.f32.mrf.mxu0  ;;  %v5069_v49 = vld [vmem:[#allocation6_spill] sm:$0xff] }
 0x1d6   : > { %v2387_v9 = vpop.f32.mrf.mxu1  ;;  %v2191_v37 = vadd.f32 %v5068_v29, %v1894_v36  ;;  %v1895_v63 = vadd.f32 %v5070_v20, %v5069_v49  ;;  %v2189_v61 = vadd.f32 %v5071_v55, %v1892_v60 }
 0x1d7   : > { %2869 = vst [vmem:[%s4861_s19 + $0x48] sm:$0xff] %v2837_v0  ;;  %v2842_v56 = vmax.f32 %v2810_v27, 0.0  ;;  %v2808_v48 = vadd.f32 %v4847_v44, %v2769_v24  ;;  %v2772_v46 = vadd.f32 %v3787_v51, %v2478_v31  ;;  %v2476_v16 = vadd.f32 %v2387_v9, %v2182_v62  ;;  %v3790_v38 = vpop.f32.mrf.mxu0  ;;  %v5072_v0 = vld [vmem:[#allocation7_spill] sm:$0xff]  ;;  %v5073_v27 = vld [vmem:[#allocation28_spill] sm:$0xff]  ;;  %v5074_v9 = vld [vmem:[#allocation25_spill] sm:$0xff] }
 0x1d8   : > { %v3756_v19 = vpop.f32.mrf.mxu1  ;;  %v1893_v24 = vadd.f32 %v5073_v27, %v5072_v0 }
 0x1d9   : > { %2874 = vst [vmem:[%s4861_s19 + $0x70] sm:$0xff] %v2842_v56  ;;  %v2840_v33 = vmax.f32 %v2808_v48, 0.0  ;;  %v2811_v34 = vadd.f32 %v4847_v44, %v2772_v46  ;;  %v2770_v50 = vadd.f32 %v2681_v43, %v2476_v16  ;;  %v2481_v26 = vadd.f32 %v3756_v19, %v2187_v39  ;;  %v2694_v5 = vpop.f32.mrf.mxu0  ;;  %v5075_v48 = vld [vmem:[#allocation8_spill] sm:$0xff]  ;;  %v5076_v46 = vld [vmem:[#allocation30_spill] sm:$0xff]  ;;  %v5077_v19 = vld [vmem:[#allocation27_spill] sm:$0xff] }
 0x1da   : > { %v2400_v3 = vpop.f32.mrf.mxu1  ;;  %v2192_v56 = vadd.f32 %v5074_v9, %v1895_v63  ;;  %v1898_v16 = vadd.f32 %v5076_v46, %v5075_v48 }
 0x1db   : > { %2872 = vst [vmem:[%s4861_s19 + $0x60] sm:$0xff] %v2840_v33  ;;  %v2843_v52 = vmax.f32 %v2811_v34, 0.0  ;;  %v2809_v47 = vadd.f32 %v4847_v44, %v2770_v50  ;;  %v2775_v40 = vadd.f32 %v3790_v38, %v2481_v26  ;;  %v2479_v7 = vadd.f32 %v2400_v3, %v2185_v57  ;;  %v3791_v8 = vpop.f32.mrf.mxu0  ;;  %v5078_v34 = vld [vmem:[#allocation9_spill] sm:$0xff]  ;;  %v5079_v50 = vld [vmem:[#allocation32_spill] sm:$0xff] }
 0x1dc   : > { %v3757_v18 = vpop.f32.mrf.mxu1  ;;  %v2190_v33 = vadd.f32 %v5077_v19, %v1893_v24  ;;  %v1896_v26 = vadd.f32 %v5079_v50, %v5078_v34  ;;  %v5080_v3 = vld [vmem:[#allocation29_spill] sm:$0xff] }
 0x1dd   : > { %2875 = vst [vmem:[%s4861_s19 + $0x78] sm:$0xff] %v2843_v52  ;;  %v2841_v59 = vmax.f32 %v2809_v47, 0.0  ;;  %v2814_v25 = vadd.f32 %v4847_v44, %v2775_v40  ;;  %v2773_v14 = vadd.f32 %v2694_v5, %v2479_v7  ;;  %v2482_v23 = vadd.f32 %v3757_v18, %v2188_v13  ;;  %v2697_v28 = vpop.f32.mrf.mxu0  ;;  %v5081_v47 = vld [vmem:[#allocation10_spill] sm:$0xff]  ;;  %v5083_v18 = vld [vmem:[#allocation31_spill] sm:$0xff] }
 0x1de   : > { %v2403_v53 = vpop.f32.mrf.mxu1  ;;  %v2195_v52 = vadd.f32 %v5080_v3, %v1898_v16  ;;  %v5082_v40 = vld [vmem:[#allocation34_spill] sm:$0xff] }
 0x1df   : > { %2873 = vst [vmem:[%s4861_s19 + $0x68] sm:$0xff] %v2841_v59  ;;  %v2846_v30 = vmax.f32 %v2814_v25, 0.0  ;;  %v2812_v2 = vadd.f32 %v4847_v44, %v2773_v14  ;;  %v2776_v15 = vadd.f32 %v3791_v8, %v2482_v23  ;;  %v2480_v51 = vadd.f32 %v2403_v53, %v2186_v32  ;;  %v3794_v62 = vpop.f32.mrf.mxu0  ;;  %v5084_v25 = vld [vmem:[#allocation11_spill] sm:$0xff]  ;;  %v5085_v14 = vld [vmem:[#allocation36_spill] sm:$0xff]  ;;  %v5086_v53 = vld [vmem:[#allocation33_spill] sm:$0xff] }
 0x1e0   : > { %v3760_v31 = vpop.f32.mrf.mxu1  ;;  %v1899_v7 = vadd.f32 %v5082_v40, %v5081_v47  ;;  %v2193_v59 = vadd.f32 %v5083_v18, %v1896_v26  ;;  %v1897_v23 = vadd.f32 %v5085_v14, %v5084_v25  ;;  %v5094_v26 = vld [vmem:[#allocation39_spill] sm:$0xff]  ;;  %v5096_v47 = vld [vmem:[#allocation41_spill] sm:$0xff] }
 0x1e1   : > { %2878 = vst [vmem:[%s4861_s19 + $0x90] sm:$0xff] %v2846_v30  ;;  %v2844_v43 = vmax.f32 %v2812_v2, 0.0  ;;  %v2815_v39 = vadd.f32 %v4847_v44, %v2776_v15  ;;  %v2774_v35 = vadd.f32 %v2697_v28, %v2480_v51  ;;  %v2485_v21 = vadd.f32 %v3760_v31, %v2191_v37  ;;  %v2710_v17 = vpop.f32.mrf.mxu0  ;;  %v5087_v2 = vld [vmem:[#allocation12_spill] sm:$0xff]  ;;  %v5088_v15 = vld [vmem:[#allocation38_spill] sm:$0xff]  ;;  %v5089_v31 = vld [vmem:[#allocation35_spill] sm:$0xff] }
 0x1e2   : > { %v2416_v38 = vpop.f32.mrf.mxu1  ;;  %v2196_v30 = vadd.f32 %v5086_v53, %v1899_v7  ;;  %v1902_v51 = vadd.f32 %v5088_v15, %v5087_v2 }
 0x1e3   : > { %2876 = vst [vmem:[%s4861_s19 + $0x80] sm:$0xff] %v2844_v43  ;;  %v2847_v6 = vmax.f32 %v2815_v39, 0.0  ;;  %v2813_v57 = vadd.f32 %v4847_v44, %v2774_v35  ;;  %v2779_v11 = vadd.f32 %v3794_v62, %v2485_v21  ;;  %v2483_v1 = vadd.f32 %v2416_v38, %v2189_v61  ;;  %v3795_v54 = vpop.f32.mrf.mxu0  ;;  %v5090_v39 = vld [vmem:[#allocation13_spill] sm:$0xff]  ;;  %v5091_v35 = vld [vmem:[#allocation40_spill] sm:$0xff] }
 0x1e4   : > { %v3761_v5 = vpop.f32.mrf.mxu1  ;;  %v2194_v43 = vadd.f32 %v5089_v31, %v1897_v23  ;;  %v1900_v21 = vadd.f32 %v5091_v35, %v5090_v39  ;;  %v5092_v38 = vld [vmem:[#allocation37_spill] sm:$0xff] }
 0x1e5   : > { %2879 = vst [vmem:[%s4861_s19 + $0x98] sm:$0xff] %v2847_v6  ;;  %v2845_v58 = vmax.f32 %v2813_v57, 0.0  ;;  %v2818_v13 = vadd.f32 %v4847_v44, %v2779_v11  ;;  %v2777_v4 = vadd.f32 %v2710_v17, %v2483_v1  ;;  %v2486_v22 = vadd.f32 %v3761_v5, %v2192_v56  ;;  %v2713_v36 = vpop.f32.mrf.mxu0  ;;  %v5093_v57 = vld [vmem:[#allocation14_spill] sm:$0xff] }
 0x1e6   : > { %v2419_v8 = vpop.f32.mrf.mxu1  ;;  %v2199_v6 = vadd.f32 %v5092_v38, %v1902_v51  ;;  %v1903_v11 = vadd.f32 %v4830_v10, %v5093_v57  ;;  %v2197_v5 = vadd.f32 %v5094_v26, %v1900_v21 }
 0x1e7   : > { %2877 = vst [vmem:[%s4861_s19 + $0x88] sm:$0xff] %v2845_v58  ;;  %v2850_v45 = vmax.f32 %v2818_v13, 0.0  ;;  %v2816_v32 = vadd.f32 %v4847_v44, %v2777_v4  ;;  %v2780_v41 = vadd.f32 %v3795_v54, %v2486_v22  ;;  %v2484_v12 = vadd.f32 %v2419_v8, %v2190_v33  ;;  %v3798_v60 = vpop.f32.mrf.mxu0  ;;  %v5095_v58 = vld [vmem:[#allocation15_spill] sm:$0xff] }
 0x1e8   : > { %v3764_v28 = vpop.f32.mrf.mxu1  ;;  %v1901_v13 = vadd.f32 %v4835_v42, %v5095_v58  ;;  %v2200_v40 = vadd.f32 %v5096_v47, %v1903_v11  ;;  %v5097_v42 = vld [vmem:[#allocation42_spill] sm:$0xff] }
 0x1e9   : > { %2882 = vst [vmem:[%s4861_s19 + $0xb0] sm:$0xff] %v2850_v45  ;;  %v2848_v29 = vmax.f32 %v2816_v32, 0.0  ;;  %v2819_v37 = vadd.f32 %v4847_v44, %v2780_v41  ;;  %v2778_v49 = vadd.f32 %v2713_v36, %v2484_v12  ;;  %v2489_v20 = vadd.f32 %v3764_v28, %v2195_v52  ;;  %v2726_v63 = vpop.f32.mrf.mxu0 }
 0x1ea   : > { %v2432_v62 = vpop.f32.mrf.mxu1  ;;  %v2198_v12 = vadd.f32 %v5097_v42, %v1901_v13 }
 0x1eb   : > { %2880 = vst [vmem:[%s4861_s19 + $0xa0] sm:$0xff] %v2848_v29  ;;  %v2851_v55 = vmax.f32 %v2819_v37, 0.0  ;;  %v2817_v61 = vadd.f32 %v4847_v44, %v2778_v49  ;;  %v2783_v0 = vadd.f32 %v3798_v60, %v2489_v20  ;;  %v2487_v27 = vadd.f32 %v2432_v62, %v2193_v59  ;;  %v3799_v24 = vpop.f32.mrf.mxu0 }
 0x1ec   : > { %v3765_v17 = vpop.f32.mrf.mxu1 }
 0x1ed   : > { %2883 = vst [vmem:[%s4861_s19 + $0xb8] sm:$0xff] %v2851_v55  ;;  %v2849_v9 = vmax.f32 %v2817_v61, 0.0  ;;  %v2822_v56 = vadd.f32 %v4847_v44, %v2783_v0  ;;  %v2781_v48 = vadd.f32 %v2726_v63, %v2487_v27  ;;  %v2490_v46 = vadd.f32 %v3765_v17, %v2196_v30  ;;  %v2729_v16 = vpop.f32.mrf.mxu0 }
 0x1ee   : > { %v2435_v1 = vpop.f32.mrf.mxu1 }
 0x1ef   : > { %2881 = vst [vmem:[%s4861_s19 + $0xa8] sm:$0xff] %v2849_v9  ;;  %v2854_v54 = vmax.f32 %v2822_v56, 0.0  ;;  %v2820_v19 = vadd.f32 %v4847_v44, %v2781_v48  ;;  %v2784_v33 = vadd.f32 %v3799_v24, %v2490_v46  ;;  %v2488_v34 = vadd.f32 %v2435_v1, %v2194_v43  ;;  %v3802_v50 = vpop.f32.mrf.mxu0 }
 0x1f0   : > { %v3768_v4 = vpop.f32.mrf.mxu1 }
 0x1f1   : > { %2886 = vst [vmem:[%s4861_s19 + $0xd0] sm:$0xff] %v2854_v54  ;;  %v2852_v22 = vmax.f32 %v2820_v19, 0.0  ;;  %v2823_v10 = vadd.f32 %v4847_v44, %v2784_v33  ;;  %v2782_v36 = vadd.f32 %v2729_v16, %v2488_v34  ;;  %v2493_v3 = vadd.f32 %v3768_v4, %v2199_v6  ;;  %v2742_v52 = vpop.f32.mrf.mxu0 }
 0x1f2   : > { %v2448_v7 = vpop.f32.mrf.mxu1 }
 0x1f3   : > { %2884 = vst [vmem:[%s4861_s19 + $0xc0] sm:$0xff] %v2852_v22  ;;  %v2855_v8 = vmax.f32 %v2823_v10, 0.0  ;;  %v2821_v45 = vadd.f32 %v4847_v44, %v2782_v36  ;;  %v2787_v32 = vadd.f32 %v3802_v50, %v2493_v3  ;;  %v2491_v41 = vadd.f32 %v2448_v7, %v2197_v5  ;;  %v3803_v18 = vpop.f32.mrf.mxu0 }
 0x1f4   : > { %v3769_v60 = vpop.f32.mrf.mxu1 }
 0x1f5   : > { %2887 = vst [vmem:[%s4861_s19 + $0xd8] sm:$0xff] %v2855_v8  ;;  %v2853_v59 = vmax.f32 %v2821_v45, 0.0  ;;  %v2826_v25 = vadd.f32 %v4847_v44, %v2787_v32  ;;  %v2785_v14 = vadd.f32 %v2742_v52, %v2491_v41  ;;  %v2494_v23 = vadd.f32 %v3769_v60, %v2200_v40  ;;  %v2745_v63 = vpop.f32.mrf.mxu0 }
 0x1f6   : > { %v2451_v28 = vpop.f32.mrf.mxu1 }
 0x1f7   : > { %2885 = vst [vmem:[%s4861_s19 + $0xc8] sm:$0xff] %v2853_v59  ;;  %v2858_v29 = vmax.f32 %v2826_v25, 0.0  ;;  %v2824_v37 = vadd.f32 %v4847_v44, %v2785_v14  ;;  %v2788_v49 = vadd.f32 %v3803_v18, %v2494_v23  ;;  %v2492_v20 = vadd.f32 %v2451_v28, %v2198_v12 }
 0x1f9   : > { %2890 = vst [vmem:[%s4861_s19 + $0xf0] sm:$0xff] %v2858_v29  ;;  %v2856_v53 = vmax.f32 %v2824_v37, 0.0  ;;  %v2827_v30 = vadd.f32 %v4847_v44, %v2788_v49  ;;  %v2786_v2 = vadd.f32 %v2745_v63, %v2492_v20 }
 0x1fb   : > { %2888 = vst [vmem:[%s4861_s19 + $0xe0] sm:$0xff] %v2856_v53  ;;  %v2859_v15 = vmax.f32 %v2827_v30, 0.0  ;;  %v2825_v51 = vadd.f32 %v4847_v44, %v2786_v2 }
 0x1fd   : > { %2891 = vst [vmem:[%s4861_s19 + $0xf8] sm:$0xff] %v2859_v15  ;;  %v2857_v62 = vmax.f32 %v2825_v51, 0.0 }
 0x1ff   : > { %2889 = vst [vmem:[%s4861_s19 + $0xe8] sm:$0xff] %v2857_v62 }
 0x200 PF: > { %s13_s14 = sadd.s32 1, %s3863_s14   ;;  %s5098_s12 = smov %s3859_s13 }
 0x201   : > { %p10_p5 = scmp.ge.s32.totalorder %s13_s14, 4   ;;  %s5099_s13 = smov %s5101_s15 }
 0x203   :  { %12 = sbr.rel (!%p10_p5) target bundleno = 2 (0x2), region = 73 }

</bundles_post_ra>
